<compile_context>
chip_gen: v6e
topology: v6e:2x2x1
jax: 0.10.0
libtpu: 0.0.40
codegen_flags: <defaults>
</compile_context>

<pallas_src>
import functools

import jax
import jax.numpy as jnp
from jax.experimental import pallas as pl
from jax.experimental.pallas import tpu as pltpu


def _tensorcores_per_chip() -> int:
    """Best-effort TensorCore count per chip (2 on v7x, 1 on v5e/v6e)."""
    try:
        kind = getattr(jax.devices()[0], "device_kind", "") or ""
        if "v7" in kind.lower():
            return 2
    except Exception:
        pass
    return 1


def _rank_count_kernel(q_ref, db_ref, gts_ref, gtid_ref, out_ref, *, n_valid, n_inner):
    """Per query: lane-dense partial counts of DB items strictly more similar
    than the GT item, accumulated into a resident [B, 128] f32 block."""
    o = pl.program_id(0)  # outer DB split ("parallel" -> megacore on 2-TC chips)
    i = pl.program_id(1)  # inner DB reduction ("arbitrary")

    @pl.when(i == 0)
    def _():
        out_ref[...] = jnp.zeros_like(out_ref)

    # [B, D] @ [D, tn] -> [B, tn] cosine similarities (bf16 in, f32 accumulate).
    sims = jnp.dot(q_ref[...], db_ref[...], preferred_element_type=jnp.float32)

    tn = sims.shape[-1]
    col0 = (o * n_inner + i) * tn  # first global DB column of this tile (scalar)
    # Offset-free, tile-local column ids; GT column / valid width are rebased
    # instead of adding col0 to the whole [B, tn] iota each step.
    col_ids = jax.lax.broadcasted_iota(jnp.int32, sims.shape, 1)

    gt_sim = gts_ref[...]              # [B, 1] f32, broadcasts over lanes
    gt_col_rel = gtid_ref[...] - col0  # [B, 1] i32, tile-local GT column
    n_valid_rel = n_valid - col0       # scalar i32, tile-local valid width

    # Mask padded tail columns and the GT column itself.
    valid = (col_ids < n_valid_rel) & (col_ids != gt_col_rel)
    hits = jnp.where(valid & (sims > gt_sim), jnp.float32(1.0), jnp.float32(0.0))

    # Lane-dense accumulation: fold the tn lanes down to a single 128-lane
    # column with pure VPU adds (static, 128-aligned lane slices -> no
    # relayout, no XLU, no masked single-lane stores).  The one cross-lane
    # reduce happens once, outside the kernel.
    partial = hits[:, 0:128]
    for k in range(1, tn // 128):
        partial = partial + hits[:, k * 128:(k + 1) * 128]
    out_ref[...] += partial


@functools.partial(
    jax.jit,
    static_argnames=("n_valid", "tn", "n_outer", "n_inner", "vmem_limit"),
)
def _rank_counts(q_bf16, db_tiles, gt_sims, gt_cols, *,
                 n_valid, tn, n_outer, n_inner, vmem_limit):
    B, D = q_bf16.shape
    kernel = functools.partial(_rank_count_kernel, n_valid=n_valid, n_inner=n_inner)
    partial = pl.pallas_call(
        kernel,
        out_shape=jax.ShapeDtypeStruct((n_outer, B, 128), jnp.float32),
        grid_spec=pltpu.PrefetchScalarGridSpec(
            num_scalar_prefetch=0,
            grid=(n_outer, n_inner),
            in_specs=[
                pl.BlockSpec((B, D), lambda o, i: (0, 0)),        # queries (resident)
                # One fully contiguous [D, tn] DB slab per step (tile-major layout).
                pl.BlockSpec((None, D, tn), lambda o, i: (o * n_inner + i, 0, 0)),
                pl.BlockSpec((B, 1), lambda o, i: (0, 0)),        # gt sims (resident)
                pl.BlockSpec((B, 1), lambda o, i: (0, 0)),        # gt col idx (resident)
            ],
            # Resident lane-dense accumulator per outer slot.
            out_specs=pl.BlockSpec((None, B, 128), lambda o, i: (o, 0, 0)),
        ),
        compiler_params=pltpu.CompilerParams(
            dimension_semantics=("parallel", "arbitrary"),
            vmem_limit_bytes=vmem_limit,
        ),
    )(q_bf16, db_tiles, gt_sims, gt_cols)
    # Single cross-lane reduce + outer-split combine (tiny, done in the wrapper).
    return jnp.sum(partial, axis=(0, 2))  # [B]


class MRRPallas:
    """Synthetic, Pallas-backed equivalent of metric/mrr.py::MRR."""

    # TODO(synk): the original module loads vectors from parquet into a vector
    # DB and looks up GT items by (id, locale) strings; here the DB is an
    # in-memory array and GT items are integer row indices.

    def __init__(self, db_vectors, alpha: float = 1.0, limit: int = 100, tn=None):
        self.alpha = float(alpha)
        self.limit = int(limit)

        db = jnp.asarray(db_vectors, jnp.float32)
        N, D = db.shape
        self.n = int(N)

        # Cosine-similarity index: L2-normalize in f32, then store bf16
        # (halves the HBM bytes of the streamed DB -- the binding resource).
        db_norm = db / (jnp.linalg.norm(db, axis=-1, keepdims=True) + 1e-12)
        self.db_norm_bf16 = db_norm.astype(jnp.bfloat16)  # [N, D] (for GT gather)

        # DB tile size: auto-size to ~4 MiB of bf16 per tile (8 MiB
        # double-buffered), which amortizes the ~0.35 us per-grid-step
        # overhead to <10% of the HBM roofline on v5e/v6e/v7x while staying
        # well inside v7x's 64 MiB per-TC VMEM.  (tn=16384 at D=128,
        # tn=2048 at D=1024.)  Always a multiple of 128, capped at the
        # lane-padded DB size.
        n_pad128 = ((N + 127) // 128) * 128
        if tn is None:
            tn = (4 * 1024 * 1024) // (2 * D)
        tn = max(128, (int(tn) // 128) * 128)
        tn = min(tn, n_pad128)
        n_blocks = -(-N // tn)

        # 2-way "parallel" outer split only when the chip actually has two
        # TensorCores (v7x).  On single-TC v5e/v6e the split (and any padded
        # dummy tile) would just waste a grid step / a full tile of HBM traffic.
        cores = _tensorcores_per_chip()
        if cores >= 2 and n_blocks >= 2:
            if n_blocks % 2 == 1:
                n_blocks += 1  # one fully-masked tile; worth it for the 2x megacore split
            n_outer = 2
        else:
            n_outer = 1
        n_inner = n_blocks // n_outer
        n_total = n_blocks * tn

        # Tile-major layout [n_blocks, D, tn]: each grid step DMAs one fully
        # contiguous slab instead of D strided row segments.  Zero-padded tail
        # columns are masked in-kernel.
        dbT = jnp.zeros((D, n_total), jnp.bfloat16).at[:, :N].set(self.db_norm_bf16.T)
        self.db_tiles = dbT.reshape(D, n_blocks, tn).transpose(1, 0, 2)

        self.tn = tn
        self.n_outer = n_outer
        self.n_inner = n_inner

        # VMEM headroom: double-buffered DB tiles + resident queries/outputs +
        # f32 sims intermediates.  Capped at 48 MiB so it also fits v7x's
        # 64 MiB per-TC VMEM; v5e/v6e have 128 MiB physical so this is safe.
        tile_bytes = 2 * D * tn
        self.vmem_limit = int(min(48 * 1024 * 1024,
                                  max(32 * 1024 * 1024,
                                      3 * tile_bytes + 8 * 1024 * 1024)))

    def __call__(self, y_hat, gt_indices):
        """
        y_hat:      [B, D] float32 query embeddings.
        gt_indices: [B] int32 indices of the ground-truth products in the DB
                    (stand-in for (gt_ids, gt_locales) -> DB row lookup).
        Returns scalar MRR (float32), shape [].
        """
        y_hat = jnp.asarray(y_hat, jnp.float32)
        q_norm = y_hat / (jnp.linalg.norm(y_hat, axis=-1, keepdims=True) + 1e-12)
        q_bf16 = q_norm.astype(jnp.bfloat16)
        B = q_bf16.shape[0]

        gt_cols = jnp.asarray(gt_indices, jnp.int32)[:, None]  # [B, 1]
        # GT similarity through the same bf16-product path as the kernel
        # (bf16*bf16 products are exact in f32; the GT column is masked out in
        # the kernel, so residual accumulation-order ULPs cannot flip the rank).
        gt_emb = self.db_norm_bf16[gt_cols[:, 0]]  # [B, D] bf16
        gt_sims = jnp.sum(
            q_bf16.astype(jnp.float32) * gt_emb.astype(jnp.float32),
            axis=-1, keepdims=True,
        )  # [B, 1] f32

        # Pad the batch to a multiple of 16 (bf16 sublane packing of the
        # resident query block).  Padded rows are +inf gt_sims / -1 gt_cols so
        # they never register hits; they are sliced off before the mean.
        B_pad = ((B + 15) // 16) * 16
        if B_pad != B:
            pad = B_pad - B
            q_bf16 = jnp.pad(q_bf16, ((0, pad), (0, 0)))
            gt_sims = jnp.pad(gt_sims, ((0, pad), (0, 0)), constant_values=jnp.inf)
            gt_cols = jnp.pad(gt_cols, ((0, pad), (0, 0)), constant_values=-1)

        counts = _rank_counts(
            q_bf16, self.db_tiles, gt_sims, gt_cols,
            n_valid=self.n, tn=self.tn,
            n_outer=self.n_outer, n_inner=self.n_inner,
            vmem_limit=self.vmem_limit,
        )[:B]  # [B]

        ranks = counts + 1.0  # 1-indexed rank
        # Reference stores (i+1)/alpha for top-`limit` matches; reciprocal is
        # alpha/rank inside the top-`limit`, 0 (1/inf) otherwise.
        recip = jnp.where(ranks <= self.limit, self.alpha / ranks, 0.0)
        return jnp.mean(recip)


if __name__ == "__main__":
    key = jax.random.PRNGKey(0)
    k_db, k_q1, k_q2, k_gt = jax.random.split(key, 4)

    # N not a multiple of tn -> exercises the masked tail; tn=2048 -> several
    # DB tiles, exercising the inner accumulation (and the outer split when
    # run on a 2-TC chip).
    B, D, N = 8, 128, 6000
    tn = 2048

    db_vectors = jax.random.normal(k_db, (N, D), jnp.float32)
    gt_indices = jax.random.randint(k_gt, (B,), 0, N, jnp.int32)
    # First half: noisy copies of their GT embeddings (rank ~1);
    # second half: unrelated random queries (GT typically outside the top-100).
    y_noisy = db_vectors[gt_indices[:4]] + 0.5 * jax.random.normal(k_q1, (4, D), jnp.float32)
    y_rand = jax.random.normal(k_q2, (4, D), jnp.float32)
    y_hat = jnp.concatenate([y_noisy, y_rand], axis=0)

    mrr_module = MRRPallas(db_vectors, alpha=1.0, limit=100, tn=tn)
    mrr = mrr_module(y_hat, gt_indices)
    jax.block_until_ready(mrr)

    # Pure-JAX reference through the same bf16 similarity path.
    qn = y_hat / (jnp.linalg.norm(y_hat, axis=-1, keepdims=True) + 1e-12)
    dn = db_vectors / (jnp.linalg.norm(db_vectors, axis=-1, keepdims=True) + 1e-12)
    qn_b = qn.astype(jnp.bfloat16).astype(jnp.float32)
    dn_b = dn.astype(jnp.bfloat16).astype(jnp.float32)
    sims_ref = qn_b @ dn_b.T  # [B, N]
    gt_sims_ref = jnp.sum(qn_b * dn_b[gt_indices], axis=-1, keepdims=True)
    col = jnp.arange(N)[None, :]
    counts_ref = jnp.sum(
        ((sims_ref > gt_sims_ref) & (col != gt_indices[:, None])).astype(jnp.float32),
        axis=-1,
    )
    ranks_ref = counts_ref + 1.0
    mrr_ref = jnp.mean(jnp.where(ranks_ref <= 100, 1.0 / ranks_ref, 0.0))
    assert jnp.allclose(mrr, mrr_ref, atol=1e-5), (mrr, mrr_ref)

    print("KERNEL_OK")
</pallas_src>

<mosaic_0001>
module attributes {stable_mosaic.version = 11 : i64} {
  func.func @_rank_count_kernel(%arg0: i32, %arg1: i32, %arg2: memref<16x128xbf16, #tpu.memory_space<vmem>>, %arg3: memref<1x128x2048xbf16, #tpu.memory_space<vmem>>, %arg4: memref<16x1xf32, #tpu.memory_space<vmem>>, %arg5: memref<16x1xi32, #tpu.memory_space<vmem>>, %arg6: memref<1x16x128xf32, #tpu.memory_space<vmem>>) attributes {dimension_semantics = [#tpu.dimension_semantics<parallel>, #tpu.dimension_semantics<arbitrary>], iteration_bounds = array<i64: 1, 3>, scalar_prefetch = 0 : i64, scratch_operands = 0 : i64, tpu.core_type = #tpu.core_type<tc>, window_params = [{pipeline_mode = #tpu.pipeline_mode<synchronous>, transform_indices = @transform_0, window_bounds = array<i64: 16, 128>}, {transform_indices = @transform_1, window_bounds = array<i64: 1, 128, 2048>}, {pipeline_mode = #tpu.pipeline_mode<synchronous>, transform_indices = @transform_2, window_bounds = array<i64: 16, 1>}, {pipeline_mode = #tpu.pipeline_mode<synchronous>, transform_indices = @transform_3, window_bounds = array<i64: 16, 1>}, {transform_indices = @transform_4, window_bounds = array<i64: 1, 16, 128>}]} {
    %c0_i32 = arith.constant 0 : i32
    %0 = arith.cmpi eq, %arg1, %c0_i32 : i32
    %1 = arith.extui %0 : i1 to i32
    %c0_i32_0 = arith.constant 0 : i32
    %2 = arith.cmpi ne, %1, %c0_i32_0 : i32
    scf.if %2 {
      %cst_17 = arith.constant 0.000000e+00 : f32
      %64 = vector.broadcast %cst_17 : f32 to vector<16x128xf32>
      %c0_18 = arith.constant 0 : index
      %c0_19 = arith.constant 0 : index
      %c0_20 = arith.constant 0 : index
      %65 = vector.load %arg6[%c0_18, %c0_19, %c0_20] : memref<1x16x128xf32, #tpu.memory_space<vmem>>, vector<1x16x128xf32>
      %66 = vector.shape_cast %65 : vector<1x16x128xf32> to vector<16x128xf32>
      %67 = vector.shape_cast %64 : vector<16x128xf32> to vector<1x16x128xf32>
      tpu.vector_store %arg6[%c0_18, %c0_19, %c0_20], %67 {strides = array<i32>} : memref<1x16x128xf32, #tpu.memory_space<vmem>>, vector<1x16x128xf32>,
    } else {
    }
    %c0 = arith.constant 0 : index
    %c0_1 = arith.constant 0 : index
    %3 = vector.load %arg2[%c0, %c0_1] : memref<16x128xbf16, #tpu.memory_space<vmem>>, vector<16x128xbf16>
    %c0_2 = arith.constant 0 : index
    %c0_3 = arith.constant 0 : index
    %c0_4 = arith.constant 0 : index
    %4 = vector.load %arg3[%c0_2, %c0_3, %c0_4] : memref<1x128x2048xbf16, #tpu.memory_space<vmem>>, vector<1x128x2048xbf16>
    %5 = vector.shape_cast %4 : vector<1x128x2048xbf16> to vector<128x2048xbf16>
    %cst = arith.constant dense<0.000000e+00> : vector<16x2048xf32>
    %6 = tpu.matmul %3, %5, %cst {dimension_numbers = #tpu.dot_dimension_numbers<[1], [0], [0], [1], [0, 0, 1, 1], [], []>} : vector<16x128xbf16>, vector<128x2048xbf16>, vector<16x2048xf32> -> vector<16x2048xf32>
    %c3_i32 = arith.constant 3 : i32
    %7 = arith.muli %arg0, %c3_i32 : i32
    %8 = arith.addi %7, %arg1 : i32
    %c2048_i32 = arith.constant 2048 : i32
    %9 = arith.muli %8, %c2048_i32 : i32
    %10 = tpu.iota {dimensions = array<i32: 1>} : vector<16x2048xi32>
    %c0_5 = arith.constant 0 : index
    %c0_6 = arith.constant 0 : index
    %11 = vector.load %arg4[%c0_5, %c0_6] : memref<16x1xf32, #tpu.memory_space<vmem>>, vector<16x1xf32>
    %c0_7 = arith.constant 0 : index
    %c0_8 = arith.constant 0 : index
    %12 = vector.load %arg5[%c0_7, %c0_8] : memref<16x1xi32, #tpu.memory_space<vmem>>, vector<16x1xi32>
    %13 = vector.broadcast %9 : i32 to vector<16x1xi32>
    %14 = arith.subi %12, %13 : vector<16x1xi32>
    %c6000_i32 = arith.constant 6000 : i32
    %15 = arith.subi %c6000_i32, %9 : i32
    %16 = vector.broadcast %15 : i32 to vector<16x2048xi32>
    %17 = arith.cmpi slt, %10, %16 : vector<16x2048xi32>
    %18 = vector.broadcast %14 : vector<16x1xi32> to vector<16x2048xi32>
    %19 = arith.cmpi ne, %10, %18 : vector<16x2048xi32>
    %20 = arith.andi %17, %19 : vector<16x2048xi1>
    %21 = vector.broadcast %11 : vector<16x1xf32> to vector<16x2048xf32>
    %22 = arith.cmpf ogt, %6, %21 : vector<16x2048xf32>
    %23 = arith.andi %20, %22 : vector<16x2048xi1>
    %cst_9 = arith.constant 1.000000e+00 : f32
    %cst_10 = arith.constant 0.000000e+00 : f32
    %24 = vector.broadcast %cst_9 : f32 to vector<16x2048xf32>
    %25 = vector.broadcast %cst_10 : f32 to vector<16x2048xf32>
    %26 = arith.select %23, %24, %25 : vector<16x2048xi1>, vector<16x2048xf32>
    %27 = vector.extract_strided_slice %26 {offsets = [0, 0], sizes = [16, 128], strides = [1, 1]} : vector<16x2048xf32> to vector<16x128xf32>
    %28 = vector.extract_strided_slice %26 {offsets = [0, 128], sizes = [16, 128], strides = [1, 1]} : vector<16x2048xf32> to vector<16x128xf32>
    %29 = arith.addf %27, %28 : vector<16x128xf32>
    %30 = vector.extract_strided_slice %26 {offsets = [0, 256], sizes = [16, 128], strides = [1, 1]} : vector<16x2048xf32> to vector<16x128xf32>
    %31 = arith.addf %29, %30 : vector<16x128xf32>
    %32 = vector.extract_strided_slice %26 {offsets = [0, 384], sizes = [16, 128], strides = [1, 1]} : vector<16x2048xf32> to vector<16x128xf32>
    %33 = arith.addf %31, %32 : vector<16x128xf32>
    %34 = vector.extract_strided_slice %26 {offsets = [0, 512], sizes = [16, 128], strides = [1, 1]} : vector<16x2048xf32> to vector<16x128xf32>
    %35 = arith.addf %33, %34 : vector<16x128xf32>
    %36 = vector.extract_strided_slice %26 {offsets = [0, 640], sizes = [16, 128], strides = [1, 1]} : vector<16x2048xf32> to vector<16x128xf32>
    %37 = arith.addf %35, %36 : vector<16x128xf32>
    %38 = vector.extract_strided_slice %26 {offsets = [0, 768], sizes = [16, 128], strides = [1, 1]} : vector<16x2048xf32> to vector<16x128xf32>
    %39 = arith.addf %37, %38 : vector<16x128xf32>
    %40 = vector.extract_strided_slice %26 {offsets = [0, 896], sizes = [16, 128], strides = [1, 1]} : vector<16x2048xf32> to vector<16x128xf32>
    %41 = arith.addf %39, %40 : vector<16x128xf32>
    %42 = vector.extract_strided_slice %26 {offsets = [0, 1024], sizes = [16, 128], strides = [1, 1]} : vector<16x2048xf32> to vector<16x128xf32>
    %43 = arith.addf %41, %42 : vector<16x128xf32>
    %44 = vector.extract_strided_slice %26 {offsets = [0, 1152], sizes = [16, 128], strides = [1, 1]} : vector<16x2048xf32> to vector<16x128xf32>
    %45 = arith.addf %43, %44 : vector<16x128xf32>
    %46 = vector.extract_strided_slice %26 {offsets = [0, 1280], sizes = [16, 128], strides = [1, 1]} : vector<16x2048xf32> to vector<16x128xf32>
    %47 = arith.addf %45, %46 : vector<16x128xf32>
    %48 = vector.extract_strided_slice %26 {offsets = [0, 1408], sizes = [16, 128], strides = [1, 1]} : vector<16x2048xf32> to vector<16x128xf32>
    %49 = arith.addf %47, %48 : vector<16x128xf32>
    %50 = vector.extract_strided_slice %26 {offsets = [0, 1536], sizes = [16, 128], strides = [1, 1]} : vector<16x2048xf32> to vector<16x128xf32>
    %51 = arith.addf %49, %50 : vector<16x128xf32>
    %52 = vector.extract_strided_slice %26 {offsets = [0, 1664], sizes = [16, 128], strides = [1, 1]} : vector<16x2048xf32> to vector<16x128xf32>
    %53 = arith.addf %51, %52 : vector<16x128xf32>
    %54 = vector.extract_strided_slice %26 {offsets = [0, 1792], sizes = [16, 128], strides = [1, 1]} : vector<16x2048xf32> to vector<16x128xf32>
    %55 = arith.addf %53, %54 : vector<16x128xf32>
    %56 = vector.extract_strided_slice %26 {offsets = [0, 1920], sizes = [16, 128], strides = [1, 1]} : vector<16x2048xf32> to vector<16x128xf32>
    %57 = arith.addf %55, %56 : vector<16x128xf32>
    %c0_11 = arith.constant 0 : index
    %c0_12 = arith.constant 0 : index
    %c0_13 = arith.constant 0 : index
    %58 = vector.load %arg6[%c0_11, %c0_12, %c0_13] : memref<1x16x128xf32, #tpu.memory_space<vmem>>, vector<1x16x128xf32>
    %59 = vector.shape_cast %58 : vector<1x16x128xf32> to vector<16x128xf32>
    %60 = arith.addf %59, %57 : vector<16x128xf32>
    %c0_14 = arith.constant 0 : index
    %c0_15 = arith.constant 0 : index
    %c0_16 = arith.constant 0 : index
    %61 = vector.load %arg6[%c0_14, %c0_15, %c0_16] : memref<1x16x128xf32, #tpu.memory_space<vmem>>, vector<1x16x128xf32>
    %62 = vector.shape_cast %61 : vector<1x16x128xf32> to vector<16x128xf32>
    %63 = vector.shape_cast %60 : vector<16x128xf32> to vector<1x16x128xf32>
    tpu.vector_store %arg6[%c0_14, %c0_15, %c0_16], %63 {strides = array<i32>} : memref<1x16x128xf32, #tpu.memory_space<vmem>>, vector<1x16x128xf32>,
    return
  }
  func.func @transform_0(%arg0: i32, %arg1: i32) -> (i32, i32) {
    %c0_i32 = arith.constant 0 : i32
    %c0_i32_0 = arith.constant 0 : i32
    %c0_i32_1 = arith.constant 0 : i32
    return %c0_i32, %c0_i32_0 : i32, i32
  }
  func.func @transform_1(%arg0: i32, %arg1: i32) -> (i32, i32, i32) {
    %c3_i32 = arith.constant 3 : i32
    %0 = arith.muli %arg0, %c3_i32 : i32
    %1 = arith.addi %0, %arg1 : i32
    %c0_i32 = arith.constant 0 : i32
    %c0_i32_0 = arith.constant 0 : i32
    %c0_i32_1 = arith.constant 0 : i32
    return %1, %c0_i32, %c0_i32_0 : i32, i32, i32
  }
  func.func @transform_2(%arg0: i32, %arg1: i32) -> (i32, i32) {
    %c0_i32 = arith.constant 0 : i32
    %c0_i32_0 = arith.constant 0 : i32
    %c0_i32_1 = arith.constant 0 : i32
    return %c0_i32, %c0_i32_0 : i32, i32
  }
  func.func @transform_3(%arg0: i32, %arg1: i32) -> (i32, i32) {
    %c0_i32 = arith.constant 0 : i32
    %c0_i32_0 = arith.constant 0 : i32
    %c0_i32_1 = arith.constant 0 : i32
    return %c0_i32, %c0_i32_0 : i32, i32
  }
  func.func @transform_4(%arg0: i32, %arg1: i32) -> (i32, i32, i32) {
    %c0_i32 = arith.constant 0 : i32
    %c0_i32_0 = arith.constant 0 : i32
    %c0_i32_1 = arith.constant 0 : i32
    return %arg0, %c0_i32, %c0_i32_0 : i32, i32, i32
  }
}

</mosaic_0001>

<bundles_post_ra>
// kernel: _rank_counts.1
= control target key start
LH: loop header
LB: loop body
LE: loop exit
PB: predicated region body
PF: predicated region fallthrough
CT: control target
= control target key end

     0   :  { %9 = vsyncpa [#allocation3], 0  ;;  %s2871_s0 = inlined_call_operand.hbm [shape: bf16[16,128], index: 0, kind: input, shape index: {}]   ;;  %s2872_s1 = inlined_call_operand.hbm [shape: bf16[3,128,2048], index: 1, kind: input, shape index: {}]   ;;  %s2873_s2 = inlined_call_operand.vmem [shape: f32[16,1], index: 2, kind: input, shape index: {}]   ;;  %s2874_s3 = inlined_call_operand.vmem [shape: s32[16,1], index: 3, kind: input, shape index: {}]   ;;  %s2875_s4 = inlined_call_operand.vmem [shape: f32[1,16,128], index: 4, kind: output, shape index: {}]  }
   0x1   :  { %10 = vsyncpa [#allocation5], 0 }
   0x2   :  { %12 = vsyncpa [#allocation5 + $0x1], 0  ;;  %s2086_s15 = smov 0   ;;  %s2088_s16 = smov 0  }
   0x3   :  { %s2090_s17 = smov 0   ;;  %s2092_s18 = smov 0  }
   0x4   :  { %s2094_s19 = smov 0   ;;  %s2096_s20 = smov 0  }
   0x5 LB: > { %s1723_s21 = sadd.s32 4294967295, %s2051_s20   ;;  %p75_p0 = scmp.ne.s32.totalorder %s2035_s16, %s2031_s15  ;;  %s2051_s20 = sphi %s2096_s20, %s18_s20   ;;  %s2047_s19 = sphi %s2094_s19, %s2993_s19   ;;  %s2043_s18 = sphi %s2092_s18, %s2992_s18   ;;  %s2039_s17 = sphi %s2090_s17, %s2991_s17   ;;  %s2035_s16 = sphi %s2088_s16, %s2990_s16   ;;  %s2031_s15 = sphi %s2086_s15, %s2989_s15  }
   0x6   : > { %p2116_p1 = scmp.eq.s32.totalorder %s1723_s21, 0  ;;  %p1724_p2 = scmp.ge.s32.totalorder %s2051_s20, 1 }
   0x7   : > { %p154_p3 = scmp.lt.s32.totalorder %s2051_s20, 4  ;;  %s2053_s25 = smov [#allocation2]  }
   0x8   : > { %p2124_p4 = por %p2116_p1, %p75_p0  ;;  %s166_s26 = sshll.u32 %s2053_s25, 4  ;;  %s167_s26 = int_to_ptr.vmem [resolvable:$true] %s166_s26 }
   0x9   : > { %p2128_p5 = pnand %p1724_p2, %p154_p3  ;;  %s27_s28 = sadd.s32 1, %s2047_s19 }
   0xa   : > { %s1954_s29 = scalar_lea.vmem %s167_s26, 128  ;;  %p1962_p12 = scmp.lt.s32.totalorder %s167_s26, %s167_s26 }
   0xb   : > { %p1874_p6 = pneg %p2128_p5  ;;  %p1955_p9 = scmp.ne.s32.totalorder %s167_s26, %s1954_s29 }
   0xc   : > { %p1963_p13 = scmp.lt.s32.totalorder %s1954_s29, %s1954_s29 }
   0xd   : > { %p2136_p7 = pnand %p1874_p6, %p2116_p1 }
   0xe   : > { %p1964_p0 = por %p1963_p13, %p1962_p12 }
   0xf   : > { %p1945_p8 = pneg %p2136_p7 }
  0x11   : > { %p1957_p10 = pnand %p1955_p9, %p1945_p8 }
  0x13   : > { %p1958_p11 = pneg %p1957_p10 }
  0x15   : > { %p1965_p2 = pnand %p1964_p0, %p1958_p11 }
  0x17   : > { %1968 = shalt.err (!%p1965_p2)
}
  0x18   : > { %s2054_s30 = smov 64   ;;  %s2055_s5 = smov 4  }
  0x19   : > { %1877 = dma.hbm_to_vmem [thread:$0]  (!%p2136_p7), %s2871_s0, 128, %s167_s26, [#allocation3], %s2054_s30, %s2054_s30, %s2055_s5  }
  0x1a   : > { %p28_p3 = scmp.ge.s32.totalorder %s27_s28, 3  ;;  %s62_s8 = sadd.s32 1, %s2039_s17 }
  0x1b   : > { %p69_p6 = scmp.ne.s32.totalorder %s2039_s17, %s2035_s16  ;;  %p70_p8 = scmp.eq.s32.totalorder %s2051_s20, 0 }
  0x1c   : > { %s2995_s28 = smov (%p28_p3, %s27_s28), 0  ;;  %p1883_p10 = scmp.lt.s32.totalorder %s2051_s20, 3 }
  0x1d   : > { %p71_p9 = por %p70_p8, %p69_p6  ;;  %s59_s9 = ssub.s32 %s2047_s19, %s2995_s28 }
  0x1e   : > { %s186_s10 = sand.u32 1, %s2039_s17   ;;  %p60_p11 = scmp.eq.s32.totalorder %s59_s9, 0 }
  0x1f   : > { %s1727_s11 = sshll.u32 %s186_s10, 10  ;;  %s1867_s12 = sshll.u32 %s2047_s19, 14 }
  0x20   : > { %s2162_s13 = scalar_select %p60_p11, %s2039_s17, %s62_s8  }
  0x21   : > { %s198_s21 = scalar_lea.hbm %s2872_s1, %s1867_s12  ;;  %s190_s25 = scalar_lea.vmem [#allocation4], %s1727_s11 }
  0x22   : > { %s199_s26 = sshll.u32 %s190_s25, 4  ;;  %p2167_p7 = pnand %p1883_p10, %p71_p9  ;;  %s200_s26 = int_to_ptr.vmem [resolvable:$true] %s199_s26 }
  0x23   : > { %s187_s29 = scalar_lea.sflag [#allocation5], %s186_s10  ;;  %s1982_s5 = scalar_lea.vmem %s200_s26, 16384 }
  0x24   : > { %p1971_p12 = pneg %p2167_p7  ;;  %p1983_p13 = scmp.ne.s32.totalorder %s200_s26, %s1982_s5 }
  0x25   : > { %s2056_s6 = smov [#allocation4]  }
  0x26   : > { %p1985_p0 = pnand %p1983_p13, %p1971_p12  ;;  %s1987_s7 = sshll.u32 %s2056_s6, 4  ;;  %s1988_s7 = int_to_ptr.vmem [resolvable:$false] %s1987_s7 }
  0x27   : > { %s1989_s8 = scalar_lea.vmem %s1988_s7, 32768  ;;  %p1990_p3 = scmp.lt.s32.totalorder %s200_s26, %s1988_s7 }
  0x28   : > { %p1986_p2 = pneg %p1985_p0  ;;  %p1991_p6 = scmp.lt.s32.totalorder %s1989_s8, %s1982_s5 }
  0x2a   : > { %p1992_p8 = por %p1991_p6, %p1990_p3 }
  0x2c   : > { %p1993_p9 = pnand %p1992_p8, %p1986_p2 }
  0x2e   : > { %1996 = shalt.err (!%p1993_p9)
}
  0x2f   : > { %s2057_s9 = smov 1024   ;;  %211 = sbr.rel (%p2128_p5) target bundleno = 409 (0x199), region = 36 }
  0x30   : > { %1881 = dma.hbm_to_vmem [thread:$0]  (!%p2167_p7), %s198_s21, 16384, %s200_s26, %s187_s29, %s2057_s9, %s2057_s9, %s2054_s30  }
  0x34   : > { %2022 = dma.done.wait (%p2116_p1), [#allocation3], 128  }
  0x35   : > { %2024 = vsyncadd (%p2116_p1), [#allocation3], 4294967168  ;;  %s217_s10 = sand.u32 1, %s2035_s16  }
  0x36   : > { %s1732_s11 = sshll.u32 %s217_s10, 10  ;;  %s218_s12 = scalar_lea.sflag [#allocation5], %s217_s10 }
  0x37   : > { %s2183_s14 = scalar_lea.vmem [#allocation4], %s1732_s11 }
  0x38   : > { %2026 = dma.done.wait (%p2124_p4), %s218_s12, 16384  }
  0x39   : > { %2028 = vsyncadd (%p2124_p4), %s218_s12, 4294950912  ;;  %p1733_p5 = scmp.ne.s32.totalorder %s2043_s18, 0 }
  0x3b   : > { %257 = sbr.rel (%p1733_p5) target bundleno = 66 (0x42), region = 48 }
  0x40   : > { %v2058_v0 = vmov 0.0  }
  0x41   : > { %258 = vst [vmem:[%s2875_s4] sm:$0xff] %v2058_v0  ;;  %259 = vst [vmem:[%s2875_s4 + $0x8] sm:$0xff] %v2058_v0 }
  0x42 PF: > { %v374_v1 = vld [vmem:[%s2183_s14 + $0x380] sm:$0xff]  ;;  %v375_v3 = vld [vmem:[%s2183_s14 + $0x388] sm:$0xff]  ;;  %v2059_v9 = vmov 0   ;;  %v376_v0 = vld [vmem:[%s2183_s14 + $0x390] sm:$0xff]  ;;  %s1863_s23 = sshll.u32 %s2043_s18, 11 }
  0x43   : > { %v382_v2 = vld [vmem:[%s2183_s14 + $0x3c0] sm:$0xff]  ;;  %v383_v5 = vld [vmem:[%s2183_s14 + $0x3c8] sm:$0xff]  ;;  %1068 = vmatprep.mubr.bf16.mxu0 %v2059_v9  ;;  %1111 = vmatprep.mubr.bf16.mxu1 %v2059_v9  ;;  %s1407_s8 = ssub.s32 6000, %s1863_s23 }
  0x44   : > { %v1848_v4 = vcombine.high %v374_v1, %v382_v2  ;;  %v1847_v6 = vcombine.low %v374_v1, %v382_v2  ;;  %v358_v7 = vld [vmem:[%s2183_s14 + $0x300] sm:$0xff]  ;;  %v1850_v10 = vcombine.high %v375_v3, %v383_v5  ;;  %v1849_v11 = vcombine.low %v375_v3, %v383_v5  ;;  %v359_v13 = vld [vmem:[%s2183_s14 + $0x308] sm:$0xff]  ;;  %1940 = vset.pattern.permute.xlu0 %v2059_v9  ;;  %v384_v1 = vld [vmem:[%s2183_s14 + $0x3d0] sm:$0xff] }
  0x45   : > { %v366_v8 = vld [vmem:[%s2183_s14 + $0x340] sm:$0xff]  ;;  %v367_v14 = vld [vmem:[%s2183_s14 + $0x348] sm:$0xff]  ;;  %1941 = vset.pattern.permute.xlu1 %v2059_v9  ;;  %v377_v2 = vld [vmem:[%s2183_s14 + $0x398] sm:$0xff] }
  0x46   : > { %v1832_v12 = vcombine.high %v358_v7, %v366_v8  ;;  %v342_v15 = vld [vmem:[%s2183_s14 + $0x280] sm:$0xff]  ;;  %1036 = vmatprep.subr.bf16.mxu0 %v1848_v4  ;;  %v1834_v16 = vcombine.high %v359_v13, %v367_v14  ;;  %v343_v18 = vld [vmem:[%s2183_s14 + $0x288] sm:$0xff]  ;;  %1079 = vmatprep.subr.bf16.mxu1 %v1850_v10  ;;  %v1831_v20 = vcombine.low %v358_v7, %v366_v8  ;;  %v385_v3 = vld [vmem:[%s2183_s14 + $0x3d8] sm:$0xff] }
  0x47   : > { %v350_v17 = vld [vmem:[%s2183_s14 + $0x2c0] sm:$0xff]  ;;  %v351_v19 = vld [vmem:[%s2183_s14 + $0x2c8] sm:$0xff]  ;;  %1037 = vmatpush1.bf16.msra.mxu0 %v1847_v6  ;;  %1080 = vmatpush1.bf16.msra.mxu1 %v1849_v11  ;;  %v1833_v21 = vcombine.low %v359_v13, %v367_v14  ;;  %v1852_v6 = vcombine.high %v376_v0, %v384_v1  ;;  %v1854_v7 = vcombine.high %v377_v2, %v385_v3  ;;  %v360_v8 = vld [vmem:[%s2183_s14 + $0x310] sm:$0xff] }
  0x48   : > { %1038 = vmatprep.subr.bf16.mxu0 %v1832_v12  ;;  %v1816_v22 = vcombine.high %v342_v15, %v350_v17  ;;  %1081 = vmatprep.subr.bf16.mxu1 %v1834_v16  ;;  %v1818_v23 = vcombine.high %v343_v18, %v351_v19  ;;  %v326_v24 = vld [vmem:[%s2183_s14 + $0x200] sm:$0xff]  ;;  %v327_v26 = vld [vmem:[%s2183_s14 + $0x208] sm:$0xff]  ;;  %v1815_v28 = vcombine.low %v342_v15, %v350_v17  ;;  %v368_v10 = vld [vmem:[%s2183_s14 + $0x350] sm:$0xff]  ;;  %v1404_v15 = vstv %s1863_s23 }
  0x49   : > { %v334_v25 = vld [vmem:[%s2183_s14 + $0x240] sm:$0xff]  ;;  %v335_v27 = vld [vmem:[%s2183_s14 + $0x248] sm:$0xff]  ;;  %v1817_v29 = vcombine.low %v343_v18, %v351_v19  ;;  %v2239_v11 = vld [vmem:[#allocation2] sm:$0xff]   ;;  %v1851_v14 = vcombine.low %v376_v0, %v384_v1  ;;  %v1853_v16 = vcombine.low %v377_v2, %v385_v3  ;;  %v1836_v17 = vcombine.high %v360_v8, %v368_v10 }
  0x4a   : > { %v1800_v30 = vcombine.high %v326_v24, %v334_v25  ;;  %v1802_v31 = vcombine.high %v327_v26, %v335_v27  ;;  %v310_v32 = vld [vmem:[%s2183_s14 + $0x180] sm:$0xff]  ;;  %v311_v34 = vld [vmem:[%s2183_s14 + $0x188] sm:$0xff]  ;;  %v1799_v36 = vcombine.low %v326_v24, %v334_v25  ;;  %v1801_v37 = vcombine.low %v327_v26, %v335_v27  ;;  %v361_v12 = vld [vmem:[%s2183_s14 + $0x318] sm:$0xff] }
  0x4b   : > { %1039 = vmatpush1.bf16.msra.mxu0 %v1831_v20  ;;  %1082 = vmatpush1.bf16.msra.mxu1 %v1833_v21  ;;  %v318_v33 = vld [vmem:[%s2183_s14 + $0x1c0] sm:$0xff]  ;;  %v319_v35 = vld [vmem:[%s2183_s14 + $0x1c8] sm:$0xff]  ;;  %v369_v13 = vld [vmem:[%s2183_s14 + $0x358] sm:$0xff]  ;;  %v1835_v25 = vcombine.low %v360_v8, %v368_v10 }
  0x4c   : > { %1040 = vmatprep.subr.bf16.mxu0 %v1816_v22  ;;  %1083 = vmatprep.subr.bf16.mxu1 %v1818_v23  ;;  %v1784_v38 = vcombine.high %v310_v32, %v318_v33  ;;  %v1786_v39 = vcombine.high %v311_v34, %v319_v35  ;;  %v294_v40 = vld [vmem:[%s2183_s14 + $0x100] sm:$0xff]  ;;  %v295_v42 = vld [vmem:[%s2183_s14 + $0x108] sm:$0xff]  ;;  %v1783_v44 = vcombine.low %v310_v32, %v318_v33  ;;  %v344_v19 = vld [vmem:[%s2183_s14 + $0x290] sm:$0xff] }
  0x4d   : > { %v302_v41 = vld [vmem:[%s2183_s14 + $0x140] sm:$0xff]  ;;  %v303_v43 = vld [vmem:[%s2183_s14 + $0x148] sm:$0xff]  ;;  %v1785_v45 = vcombine.low %v311_v34, %v319_v35  ;;  %v1838_v18 = vcombine.high %v361_v12, %v369_v13  ;;  %v352_v20 = vld [vmem:[%s2183_s14 + $0x2d0] sm:$0xff]  ;;  %v1837_v27 = vcombine.low %v361_v12, %v369_v13 }
  0x4e   : > { %v1768_v46 = vcombine.high %v294_v40, %v302_v41  ;;  %v1770_v47 = vcombine.high %v295_v42, %v303_v43  ;;  %v278_v48 = vld [vmem:[%s2183_s14 + $0x80] sm:$0xff]  ;;  %v279_v50 = vld [vmem:[%s2183_s14 + $0x88] sm:$0xff]  ;;  %v1767_v52 = vcombine.low %v294_v40, %v302_v41  ;;  %v1769_v53 = vcombine.low %v295_v42, %v303_v43  ;;  %v1402_v21 = vld [vmem:[%s2874_s3] sm:$0xff] }
  0x4f   : > { %1041 = vmatpush1.bf16.msra.mxu0 %v1815_v28  ;;  %1084 = vmatpush1.bf16.msra.mxu1 %v1817_v29  ;;  %v286_v49 = vld [vmem:[%s2183_s14 + $0xc0] sm:$0xff]  ;;  %v287_v51 = vld [vmem:[%s2183_s14 + $0xc8] sm:$0xff]  ;;  %v345_v22 = vld [vmem:[%s2183_s14 + $0x298] sm:$0xff]  ;;  %v1405_v24 = vsub.s32 %v1402_v21, %v1404_v15  ;;  %v1820_v28 = vcombine.high %v344_v19, %v352_v20 }
  0x50   : > { %1042 = vmatprep.subr.bf16.mxu0 %v1800_v30  ;;  %1085 = vmatprep.subr.bf16.mxu1 %v1802_v31  ;;  %v1752_v54 = vcombine.high %v278_v48, %v286_v49  ;;  %v1754_v55 = vcombine.high %v279_v50, %v287_v51  ;;  %v262_v56 = vld [vmem:[%s2183_s14] sm:$0xff]  ;;  %v263_v58 = vld [vmem:[%s2183_s14 + $0x8] sm:$0xff]  ;;  %v1751_v60 = vcombine.low %v278_v48, %v286_v49  ;;  %v353_v23 = vld [vmem:[%s2183_s14 + $0x2d8] sm:$0xff] }
  0x51   : > { %v270_v57 = vld [vmem:[%s2183_s14 + $0x40] sm:$0xff]  ;;  %v271_v59 = vld [vmem:[%s2183_s14 + $0x48] sm:$0xff]  ;;  %v1753_v61 = vcombine.low %v279_v50, %v287_v51  ;;  %v1400_v29 = vld [vmem:[%s2873_s2] sm:$0xff]  ;;  %v1822_v30 = vcombine.high %v345_v22, %v353_v23  ;;  %1426 = vperm.xlu0 %1940, %v1405_v24  }
  0x52   : > { %v1736_v62 = vcombine.high %v262_v56, %v270_v57  ;;  %v1738_v63 = vcombine.high %v263_v58, %v271_v59  ;;  %v1735_v4 = vcombine.low %v262_v56, %v270_v57  ;;  %v1737_v5 = vcombine.low %v263_v58, %v271_v59  ;;  %v1403_v26 = vld [vmem:[%s2874_s3 + $0x8] sm:$0xff]  ;;  %v328_v31 = vld [vmem:[%s2183_s14 + $0x210] sm:$0xff]  ;;  %v329_v33 = vld [vmem:[%s2183_s14 + $0x218] sm:$0xff]  ;;  %1497 = vperm.xlu1 %1941, %v1400_v29  }
  0x53   : > { %1043 = vmatpush1.bf16.msra.mxu0 %v1799_v36  ;;  %1086 = vmatpush1.bf16.msra.mxu1 %v1801_v37  ;;  %v336_v32 = vld [vmem:[%s2183_s14 + $0x250] sm:$0xff]  ;;  %v337_v34 = vld [vmem:[%s2183_s14 + $0x258] sm:$0xff]  ;;  %v1406_v35 = vsub.s32 %v1403_v26, %v1404_v15  ;;  %v1819_v36 = vcombine.low %v344_v19, %v352_v20  ;;  %v1821_v37 = vcombine.low %v345_v22, %v353_v23  ;;  %v378_v10 = vld [vmem:[%s2183_s14 + $0x3a0] sm:$0xff] }
  0x54   : > { %1044 = vmatprep.subr.bf16.mxu0 %v1784_v38  ;;  %1087 = vmatprep.subr.bf16.mxu1 %v1786_v39  ;;  %v1804_v38 = vcombine.high %v328_v31, %v336_v32  ;;  %v1401_v39 = vld [vmem:[%s2873_s2 + $0x8] sm:$0xff]  ;;  %v1806_v40 = vcombine.high %v329_v33, %v337_v34  ;;  %v312_v41 = vld [vmem:[%s2183_s14 + $0x190] sm:$0xff]  ;;  %v313_v43 = vld [vmem:[%s2183_s14 + $0x198] sm:$0xff] }
  0x55   : > { %v320_v42 = vld [vmem:[%s2183_s14 + $0x1d0] sm:$0xff]  ;;  %1429 = vperm.xlu0 %1940, %v1406_v35   ;;  %v297_v51 = vld [vmem:[%s2183_s14 + $0x118] sm:$0xff]  ;;  %v386_v12 = vld [vmem:[%s2183_s14 + $0x3e0] sm:$0xff] }
  0x56   : > { %1502 = vperm.xlu1 %1941, %v1401_v39   ;;  %v296_v49 = vld [vmem:[%s2183_s14 + $0x110] sm:$0xff]  ;;  %v281_v59 = vld [vmem:[%s2183_s14 + $0x98] sm:$0xff]  ;;  %v379_v13 = vld [vmem:[%s2183_s14 + $0x3a8] sm:$0xff]  ;;  %v1855_v23 = vcombine.low %v378_v10, %v386_v12 }
  0x57   : > { %1045 = vmatpush1.bf16.msra.mxu0 %v1783_v44  ;;  %1088 = vmatpush1.bf16.msra.mxu1 %v1785_v45  ;;  %v321_v44 = vld [vmem:[%s2183_s14 + $0x1d8] sm:$0xff]  ;;  %v1803_v45 = vcombine.low %v328_v31, %v336_v32  ;;  %v304_v50 = vld [vmem:[%s2183_s14 + $0x150] sm:$0xff]  ;;  %v362_v19 = vld [vmem:[%s2183_s14 + $0x320] sm:$0xff] }
  0x58   : > { %1046 = vmatprep.subr.bf16.mxu0 %v1768_v46  ;;  %1089 = vmatprep.subr.bf16.mxu1 %v1770_v47  ;;  %v1805_v46 = vcombine.low %v329_v33, %v337_v34  ;;  %v1788_v47 = vcombine.high %v312_v41, %v320_v42  ;;  %v1790_v48 = vcombine.high %v313_v43, %v321_v44  ;;  %v280_v57 = vld [vmem:[%s2183_s14 + $0x90] sm:$0xff]  ;;  %v265_v3 = vld [vmem:[%s2183_s14 + $0x18] sm:$0xff]  ;;  %v370_v20 = vld [vmem:[%s2183_s14 + $0x360] sm:$0xff] }
  0x59   : > { %v288_v58 = vld [vmem:[%s2183_s14 + $0xd0] sm:$0xff]  ;;  %v363_v21 = vld [vmem:[%s2183_s14 + $0x328] sm:$0xff]  ;;  %v1839_v31 = vcombine.low %v362_v19, %v370_v20  ;;  %v330_v35 = vld [vmem:[%s2183_s14 + $0x220] sm:$0xff] }
  0x5a   : > { %v264_v1 = vld [vmem:[%s2183_s14 + $0x10] sm:$0xff]  ;;  %v371_v22 = vld [vmem:[%s2183_s14 + $0x368] sm:$0xff] }
  0x5b   : > { %1047 = vmatpush1.bf16.msra.mxu0 %v1767_v52  ;;  %1090 = vmatpush1.bf16.msra.mxu1 %v1769_v53  ;;  %v305_v52 = vld [vmem:[%s2183_s14 + $0x158] sm:$0xff]  ;;  %v1787_v53 = vcombine.low %v312_v41, %v320_v42  ;;  %v272_v2 = vld [vmem:[%s2183_s14 + $0x50] sm:$0xff]  ;;  %v1842_v26 = vcombine.high %v363_v21, %v371_v22  ;;  %v347_v29 = vld [vmem:[%s2183_s14 + $0x2a8] sm:$0xff]  ;;  %v1841_v32 = vcombine.low %v363_v21, %v371_v22 }
  0x5c   : > { %1048 = vmatprep.subr.bf16.mxu0 %v1752_v54  ;;  %1091 = vmatprep.subr.bf16.mxu1 %v1754_v55  ;;  %v1789_v54 = vcombine.low %v313_v43, %v321_v44  ;;  %v1772_v55 = vcombine.high %v296_v49, %v304_v50  ;;  %v1774_v56 = vcombine.high %v297_v51, %v305_v52  ;;  %v314_v43 = vld [vmem:[%s2183_s14 + $0x1a0] sm:$0xff]  ;;  %v364_v21 = vld [vmem:[%s2183_s14 + $0x330] sm:$0xff] }
  0x5d   : > { %v1739_v15 = vcombine.low %v264_v1, %v272_v2  ;;  %v322_v44 = vld [vmem:[%s2183_s14 + $0x1e0] sm:$0xff]  ;;  %v372_v22 = vld [vmem:[%s2183_s14 + $0x370] sm:$0xff] }
  0x5f   : > { %1049 = vmatpush1.bf16.msra.mxu0 %v1751_v60  ;;  %1092 = vmatpush1.bf16.msra.mxu1 %v1753_v61  ;;  %v289_v60 = vld [vmem:[%s2183_s14 + $0xd8] sm:$0xff]  ;;  %v1771_v61 = vcombine.low %v296_v49, %v304_v50  ;;  %v1792_v49 = vcombine.high %v314_v43, %v322_v44 }
  0x60   : > { %1050 = vmatprep.subr.bf16.mxu0 %v1736_v62  ;;  %1093 = vmatprep.subr.bf16.mxu1 %v1738_v63  ;;  %v1773_v62 = vcombine.low %v297_v51, %v305_v52  ;;  %v1756_v63 = vcombine.high %v280_v57, %v288_v58  ;;  %v1758_v0 = vcombine.high %v281_v59, %v289_v60  ;;  %v298_v51 = vld [vmem:[%s2183_s14 + $0x120] sm:$0xff] }
  0x61   : > { %v306_v52 = vld [vmem:[%s2183_s14 + $0x160] sm:$0xff] }
  0x63   : > { %1051 = vmatpush1.bf16.msra.mxu0 %v1735_v4  ;;  %1094 = vmatpush1.bf16.msra.mxu1 %v1737_v5  ;;  %v273_v4 = vld [vmem:[%s2183_s14 + $0x58] sm:$0xff]  ;;  %v1755_v5 = vcombine.low %v280_v57, %v288_v58  ;;  %v1776_v57 = vcombine.high %v298_v51, %v306_v52 }
  0x64   : > { %1122 = vmatprep.subr.bf16.mxu0 %v1852_v6  ;;  %1165 = vmatprep.subr.bf16.mxu1 %v1854_v7  ;;  %v1757_v6 = vcombine.low %v281_v59, %v289_v60  ;;  %v1740_v7 = vcombine.high %v264_v1, %v272_v2  ;;  %v1742_v8 = vcombine.high %v265_v3, %v273_v4  ;;  %v282_v59 = vld [vmem:[%s2183_s14 + $0xa0] sm:$0xff] }
  0x65   : > { %v290_v60 = vld [vmem:[%s2183_s14 + $0xe0] sm:$0xff] }
  0x66   : > { %1069 = vmatmul.mubr.bf16.vlgmr.msra.gmra.mxu0 %v2239_v11  ;;  %1112 = vmatmul.mubr.bf16.vlgmr.msra.gmra.mxu1 %v2239_v11  ;;  %v1760_v1 = vcombine.high %v282_v59, %v290_v60 }
  0x67   : > { %1123 = vmatpush1.bf16.msra.mxu0 %v1851_v14  ;;  %1166 = vmatpush1.bf16.msra.mxu1 %v1853_v16  ;;  %v387_v14 = vld [vmem:[%s2183_s14 + $0x3e8] sm:$0xff]  ;;  %v1741_v16 = vcombine.low %v265_v3, %v273_v4  ;;  %v266_v3 = vld [vmem:[%s2183_s14 + $0x20] sm:$0xff] }
  0x68   : > { %1124 = vmatprep.subr.bf16.mxu0 %v1836_v17  ;;  %1167 = vmatprep.subr.bf16.mxu1 %v1838_v18  ;;  %v1856_v17 = vcombine.high %v378_v10, %v386_v12  ;;  %v1858_v18 = vcombine.high %v379_v13, %v387_v14  ;;  %v1857_v24 = vcombine.low %v379_v13, %v387_v14  ;;  %v274_v4 = vld [vmem:[%s2183_s14 + $0x60] sm:$0xff]  ;;  %v380_v13 = vld [vmem:[%s2183_s14 + $0x3b0] sm:$0xff] }
  0x69   : > { %1154 = vmatprep.mubr.bf16.mxu0 %v2059_v9  ;;  %1197 = vmatprep.mubr.bf16.mxu1 %v2059_v9  ;;  %v1744_v10 = vcombine.high %v266_v3, %v274_v4  ;;  %v388_v14 = vld [vmem:[%s2183_s14 + $0x3f0] sm:$0xff] }
  0x6b   : > { %1125 = vmatpush1.bf16.msra.mxu0 %v1835_v25  ;;  %1168 = vmatpush1.bf16.msra.mxu1 %v1837_v27  ;;  %v1840_v25 = vcombine.high %v362_v19, %v370_v20  ;;  %v346_v27 = vld [vmem:[%s2183_s14 + $0x2a0] sm:$0xff]  ;;  %v1860_v19 = vcombine.high %v380_v13, %v388_v14 }
  0x6c   : > { %1126 = vmatprep.subr.bf16.mxu0 %v1820_v28  ;;  %1169 = vmatprep.subr.bf16.mxu1 %v1822_v30  ;;  %v354_v28 = vld [vmem:[%s2183_s14 + $0x2e0] sm:$0xff]  ;;  %v355_v30 = vld [vmem:[%s2183_s14 + $0x2e8] sm:$0xff] }
  0x6d   : > { %v1824_v33 = vcombine.high %v346_v27, %v354_v28  ;;  %v1826_v34 = vcombine.high %v347_v29, %v355_v30  ;;  %v1823_v39 = vcombine.low %v346_v27, %v354_v28  ;;  %v1844_v27 = vcombine.high %v364_v21, %v372_v22 }
  0x6f   : > { %1127 = vmatpush1.bf16.msra.mxu0 %v1819_v36  ;;  %1170 = vmatpush1.bf16.msra.mxu1 %v1821_v37  ;;  %v338_v36 = vld [vmem:[%s2183_s14 + $0x260] sm:$0xff]  ;;  %v331_v37 = vld [vmem:[%s2183_s14 + $0x228] sm:$0xff] }
  0x70   : > { %1128 = vmatprep.subr.bf16.mxu0 %v1804_v38  ;;  %1171 = vmatprep.subr.bf16.mxu1 %v1806_v40  ;;  %v339_v38 = vld [vmem:[%s2183_s14 + $0x268] sm:$0xff]  ;;  %v1825_v40 = vcombine.low %v347_v29, %v355_v30  ;;  %v1808_v41 = vcombine.high %v330_v35, %v338_v36  ;;  %v348_v29 = vld [vmem:[%s2183_s14 + $0x2b0] sm:$0xff] }
  0x71   : > { %v1810_v42 = vcombine.high %v331_v37, %v339_v38  ;;  %v356_v30 = vld [vmem:[%s2183_s14 + $0x2f0] sm:$0xff] }
  0x73   : > { %1129 = vmatpush1.bf16.msra.mxu0 %v1803_v45  ;;  %1172 = vmatpush1.bf16.msra.mxu1 %v1805_v46  ;;  %v315_v45 = vld [vmem:[%s2183_s14 + $0x1a8] sm:$0xff] }
  0x74   : > { %1130 = vmatprep.subr.bf16.mxu0 %v1788_v47  ;;  %1173 = vmatprep.subr.bf16.mxu1 %v1790_v48  ;;  %v323_v46 = vld [vmem:[%s2183_s14 + $0x1e8] sm:$0xff]  ;;  %v1807_v47 = vcombine.low %v330_v35, %v338_v36  ;;  %v1809_v48 = vcombine.low %v331_v37, %v339_v38  ;;  %v1828_v35 = vcombine.high %v348_v29, %v356_v30  ;;  %v332_v37 = vld [vmem:[%s2183_s14 + $0x230] sm:$0xff] }
  0x75   : > { %v1794_v50 = vcombine.high %v315_v45, %v323_v46  ;;  %v340_v38 = vld [vmem:[%s2183_s14 + $0x270] sm:$0xff] }
  0x77   : > { %1131 = vmatpush1.bf16.msra.mxu0 %v1787_v53  ;;  %1174 = vmatpush1.bf16.msra.mxu1 %v1789_v54  ;;  %v299_v53 = vld [vmem:[%s2183_s14 + $0x128] sm:$0xff] }
  0x78   : > { %1132 = vmatprep.subr.bf16.mxu0 %v1772_v55  ;;  %1175 = vmatprep.subr.bf16.mxu1 %v1774_v56  ;;  %v307_v54 = vld [vmem:[%s2183_s14 + $0x168] sm:$0xff]  ;;  %v1791_v55 = vcombine.low %v314_v43, %v322_v44  ;;  %v1793_v56 = vcombine.low %v315_v45, %v323_v46  ;;  %v1812_v43 = vcombine.high %v332_v37, %v340_v38  ;;  %v316_v45 = vld [vmem:[%s2183_s14 + $0x1b0] sm:$0xff] }
  0x79   : > { %v1778_v58 = vcombine.high %v299_v53, %v307_v54  ;;  %v324_v46 = vld [vmem:[%s2183_s14 + $0x1f0] sm:$0xff] }
  0x7b   : > { %1133 = vmatpush1.bf16.msra.mxu0 %v1771_v61  ;;  %1176 = vmatpush1.bf16.msra.mxu1 %v1773_v62  ;;  %v283_v61 = vld [vmem:[%s2183_s14 + $0xa8] sm:$0xff] }
  0x7c   : > { %1134 = vmatprep.subr.bf16.mxu0 %v1756_v63  ;;  %1177 = vmatprep.subr.bf16.mxu1 %v1758_v0  ;;  %v291_v62 = vld [vmem:[%s2183_s14 + $0xe8] sm:$0xff]  ;;  %v1775_v63 = vcombine.low %v298_v51, %v306_v52  ;;  %v1777_v0 = vcombine.low %v299_v53, %v307_v54  ;;  %v300_v52 = vld [vmem:[%s2183_s14 + $0x130] sm:$0xff]  ;;  %v301_v54 = vld [vmem:[%s2183_s14 + $0x138] sm:$0xff] }
  0x7d   : > { %v1762_v2 = vcombine.high %v283_v61, %v291_v62  ;;  %v308_v53 = vld [vmem:[%s2183_s14 + $0x170] sm:$0xff] }
  0x7f   : > { %1135 = vmatpush1.bf16.msra.mxu0 %v1755_v5  ;;  %1178 = vmatpush1.bf16.msra.mxu1 %v1757_v6  ;;  %v267_v5 = vld [vmem:[%s2183_s14 + $0x28] sm:$0xff] }
  0x80   : > { %1136 = vmatprep.subr.bf16.mxu0 %v1740_v7  ;;  %1179 = vmatprep.subr.bf16.mxu1 %v1742_v8  ;;  %v275_v6 = vld [vmem:[%s2183_s14 + $0x68] sm:$0xff]  ;;  %v1759_v7 = vcombine.low %v282_v59, %v290_v60  ;;  %v1761_v8 = vcombine.low %v283_v61, %v291_v62  ;;  %v284_v60 = vld [vmem:[%s2183_s14 + $0xb0] sm:$0xff]  ;;  %v285_v62 = vld [vmem:[%s2183_s14 + $0xb8] sm:$0xff] }
  0x81   : > { %v1746_v12 = vcombine.high %v267_v5, %v275_v6  ;;  %v292_v61 = vld [vmem:[%s2183_s14 + $0xf0] sm:$0xff] }
  0x83   : > { %1137 = vmatpush1.bf16.msra.mxu0 %v1739_v15  ;;  %1180 = vmatpush1.bf16.msra.mxu1 %v1741_v16  ;;  %v381_v15 = vld [vmem:[%s2183_s14 + $0x3b8] sm:$0xff] }
  0x84   : > { %1208 = vmatprep.subr.bf16.mxu0 %v1856_v17  ;;  %1251 = vmatprep.subr.bf16.mxu1 %v1858_v18  ;;  %v389_v16 = vld [vmem:[%s2183_s14 + $0x3f8] sm:$0xff]  ;;  %v1743_v17 = vcombine.low %v266_v3, %v274_v4  ;;  %v1745_v18 = vcombine.low %v267_v5, %v275_v6  ;;  %v268_v4 = vld [vmem:[%s2183_s14 + $0x30] sm:$0xff] }
  0x85   : > { %v1862_v20 = vcombine.high %v381_v15, %v389_v16  ;;  %v276_v5 = vld [vmem:[%s2183_s14 + $0x70] sm:$0xff]  ;;  %v269_v6 = vld [vmem:[%s2183_s14 + $0x38] sm:$0xff] }
  0x86   : > { %1155 = vmatmul.mubr.bf16.vlgmr.msra.gmra.mxu0 %v2239_v11  ;;  %1198 = vmatmul.mubr.bf16.vlgmr.msra.gmra.mxu1 %v2239_v11 }
  0x87   : > { %1209 = vmatpush1.bf16.msra.mxu0 %v1855_v23  ;;  %1252 = vmatpush1.bf16.msra.mxu1 %v1857_v24  ;;  %v365_v23 = vld [vmem:[%s2183_s14 + $0x338] sm:$0xff] }
  0x88   : > { %1210 = vmatprep.subr.bf16.mxu0 %v1840_v25  ;;  %1253 = vmatprep.subr.bf16.mxu1 %v1842_v26  ;;  %v373_v24 = vld [vmem:[%s2183_s14 + $0x378] sm:$0xff]  ;;  %v1859_v25 = vcombine.low %v380_v13, %v388_v14  ;;  %v1861_v26 = vcombine.low %v381_v15, %v389_v16  ;;  %v1747_v14 = vcombine.low %v268_v4, %v276_v5  ;;  %v1383_v16 = vlaneseq }
  0x89   : > { %1240 = vmatprep.mubr.bf16.mxu0 %v2059_v9  ;;  %1283 = vmatprep.mubr.bf16.mxu1 %v2059_v9  ;;  %v1846_v28 = vcombine.high %v365_v23, %v373_v24 }
  0x8b   : > { %1211 = vmatpush1.bf16.msra.mxu0 %v1839_v31  ;;  %1254 = vmatpush1.bf16.msra.mxu1 %v1841_v32  ;;  %v349_v31 = vld [vmem:[%s2183_s14 + $0x2b8] sm:$0xff] }
  0x8c   : > { %1212 = vmatprep.subr.bf16.mxu0 %v1824_v33  ;;  %1255 = vmatprep.subr.bf16.mxu1 %v1826_v34  ;;  %v357_v32 = vld [vmem:[%s2183_s14 + $0x2f8] sm:$0xff]  ;;  %v1843_v33 = vcombine.low %v364_v21, %v372_v22  ;;  %v1845_v34 = vcombine.low %v365_v23, %v373_v24 }
  0x8d   : > { %v1830_v36 = vcombine.high %v349_v31, %v357_v32 }
  0x8f   : > { %1213 = vmatpush1.bf16.msra.mxu0 %v1823_v39  ;;  %1256 = vmatpush1.bf16.msra.mxu1 %v1825_v40  ;;  %v333_v39 = vld [vmem:[%s2183_s14 + $0x238] sm:$0xff] }
  0x90   : > { %1214 = vmatprep.subr.bf16.mxu0 %v1808_v41  ;;  %1257 = vmatprep.subr.bf16.mxu1 %v1810_v42  ;;  %v341_v40 = vld [vmem:[%s2183_s14 + $0x278] sm:$0xff]  ;;  %v1827_v41 = vcombine.low %v348_v29, %v356_v30  ;;  %v1829_v42 = vcombine.low %v349_v31, %v357_v32 }
  0x91   : > { %v1814_v44 = vcombine.high %v333_v39, %v341_v40 }
  0x93   : > { %1215 = vmatpush1.bf16.msra.mxu0 %v1807_v47  ;;  %1258 = vmatpush1.bf16.msra.mxu1 %v1809_v48  ;;  %v317_v47 = vld [vmem:[%s2183_s14 + $0x1b8] sm:$0xff] }
  0x94   : > { %1216 = vmatprep.subr.bf16.mxu0 %v1792_v49  ;;  %1259 = vmatprep.subr.bf16.mxu1 %v1794_v50  ;;  %v325_v48 = vld [vmem:[%s2183_s14 + $0x1f8] sm:$0xff]  ;;  %v1811_v49 = vcombine.low %v332_v37, %v340_v38  ;;  %v1796_v50 = vcombine.high %v316_v45, %v324_v46 }
  0x95   : > { %v1798_v51 = vcombine.high %v317_v47, %v325_v48 }
  0x97   : > { %1217 = vmatpush1.bf16.msra.mxu0 %v1791_v55  ;;  %1260 = vmatpush1.bf16.msra.mxu1 %v1793_v56  ;;  %v309_v55 = vld [vmem:[%s2183_s14 + $0x178] sm:$0xff]  ;;  %v1795_v56 = vcombine.low %v316_v45, %v324_v46 }
  0x98   : > { %1218 = vmatprep.subr.bf16.mxu0 %v1776_v57  ;;  %1261 = vmatprep.subr.bf16.mxu1 %v1778_v58  ;;  %v1797_v57 = vcombine.low %v317_v47, %v325_v48  ;;  %v1780_v58 = vcombine.high %v300_v52, %v308_v53  ;;  %v1782_v59 = vcombine.high %v301_v54, %v309_v55 }
  0x9b   : > { %1219 = vmatpush1.bf16.msra.mxu0 %v1775_v63  ;;  %1262 = vmatpush1.bf16.msra.mxu1 %v1777_v0  ;;  %v293_v63 = vld [vmem:[%s2183_s14 + $0xf8] sm:$0xff]  ;;  %v1779_v0 = vcombine.low %v300_v52, %v308_v53  ;;  %v2908_v53 = vmov 0 }
  0x9c   : > { %1220 = vmatprep.subr.bf16.mxu0 %v1760_v1  ;;  %1263 = vmatprep.subr.bf16.mxu1 %v1762_v2  ;;  %v1781_v1 = vcombine.low %v301_v54, %v309_v55  ;;  %v1764_v2 = vcombine.high %v284_v60, %v292_v61  ;;  %v1766_v3 = vcombine.high %v285_v62, %v293_v63 }
  0x9f   : > { %1221 = vmatpush1.bf16.msra.mxu0 %v1759_v7  ;;  %1264 = vmatpush1.bf16.msra.mxu1 %v1761_v8  ;;  %v277_v7 = vld [vmem:[%s2183_s14 + $0x78] sm:$0xff]  ;;  %v1763_v8 = vcombine.low %v284_v60, %v292_v61 }
  0xa0   : > { %1222 = vmatprep.subr.bf16.mxu0 %v1744_v10  ;;  %1265 = vmatprep.subr.bf16.mxu1 %v1746_v12  ;;  %v1765_v10 = vcombine.low %v285_v62, %v293_v63  ;;  %v1748_v12 = vcombine.high %v268_v4, %v276_v5  ;;  %v1750_v13 = vcombine.high %v269_v6, %v277_v7 }
  0xa1   : > { %v1749_v15 = vcombine.low %v269_v6, %v277_v7 }
  0xa3   : > { %1223 = vmatpush1.bf16.msra.mxu0 %v1743_v17  ;;  %1266 = vmatpush1.bf16.msra.mxu1 %v1745_v18  ;;  %v2363_v18 = vand.u32 127, %v1383_v16 }
  0xa4   : > { %1294 = vmatprep.subr.bf16.mxu0 %v1860_v19  ;;  %1337 = vmatprep.subr.bf16.mxu1 %v1862_v20  ;;  %v2365_v20 = vstv %s1407_s8 }
  0xa5   : > { %v1386_v21 = vadd.s32 256, %v2363_v18  ;;  %v1385_v22 = vadd.s32 128, %v2363_v18  ;;  %v1387_v24 = vadd.s32 384, %v2363_v18  ;;  %vm1409_vm0 = vcmp.lt.s32.totalorder %v2363_v18, %v2365_v20 }
  0xa6   : > { %1241 = vmatmul.mubr.bf16.vlgmr.msra.gmra.mxu0 %v2239_v11  ;;  %1284 = vmatmul.mubr.bf16.vlgmr.msra.gmra.mxu1 %v2239_v11  ;;  %v1391_v47 = vadd.s32 896, %v2363_v18  ;;  %v2537_v4 = vadd.s32 1280, %v2363_v18  ;;  %v1396_v48 = vadd.s32 1536, %v2363_v18 }
  0xa7   : > { %1295 = vmatpush1.bf16.msra.mxu0 %v1859_v25  ;;  %1338 = vmatpush1.bf16.msra.mxu1 %v1861_v26  ;;  %vm1411_vm2 = vcmp.lt.s32.totalorder %v1386_v21, %v2365_v20  ;;  %vm1410_vm4 = vcmp.lt.s32.totalorder %v1385_v22, %v2365_v20  ;;  %vm2876_vm7 = vcmp.lt.s32.totalorder %v1387_v24, %v2365_v20 }
  0xa8   : > { %1296 = vmatprep.subr.bf16.mxu0 %v1844_v27  ;;  %1339 = vmatprep.subr.bf16.mxu1 %v1846_v28 }
  0xa9   : > { %1326 = vmatprep.mubr.bf16.mxu0 %v2059_v9  ;;  %1369 = vmatprep.mubr.bf16.mxu1 %v2059_v9  ;;  %v1813_v9 = vcombine.low %v333_v39, %v341_v40  ;;  %v2433_v39 = vadd.s32 640, %v2363_v18 }
  0xab   : > { %1297 = vmatpush1.bf16.msra.mxu0 %v1843_v33  ;;  %1340 = vmatpush1.bf16.msra.mxu1 %v1845_v34  ;;  %v2895_v33 = vmov 0 }
  0xac   : > { %1298 = vmatprep.subr.bf16.mxu0 %v1828_v35  ;;  %1341 = vmatprep.subr.bf16.mxu1 %v1830_v36  ;;  %v1388_v35 = vadd.s32 512, %v2363_v18  ;;  %v1390_v36 = vadd.s32 768, %v2363_v18 }
  0xaf   : > { %1299 = vmatpush1.bf16.msra.mxu0 %v1827_v41  ;;  %1342 = vmatpush1.bf16.msra.mxu1 %v1829_v42  ;;  %v2060_v42 = vmov 0.0  }
  0xb0   : > { %1300 = vmatprep.subr.bf16.mxu0 %v1812_v43  ;;  %1343 = vmatprep.subr.bf16.mxu1 %v1814_v44 }
  0xb3   : > { %1301 = vmatpush1.bf16.msra.mxu0 %v1811_v49  ;;  %1344 = vmatpush1.bf16.msra.mxu1 %v1813_v9 }
  0xb4   : > { %1302 = vmatprep.subr.bf16.mxu0 %v1796_v50  ;;  %1345 = vmatprep.subr.bf16.mxu1 %v1798_v51  ;;  %v2905_v50 = vmov 0 }
  0xb7   : > { %1303 = vmatpush1.bf16.msra.mxu0 %v1795_v56  ;;  %1346 = vmatpush1.bf16.msra.mxu1 %v1797_v57 }
  0xb8   : > { %1304 = vmatprep.subr.bf16.mxu0 %v1780_v58  ;;  %1347 = vmatprep.subr.bf16.mxu1 %v1782_v59 }
  0xbb   : > { %1305 = vmatpush1.bf16.msra.mxu0 %v1779_v0  ;;  %1348 = vmatpush1.bf16.msra.mxu1 %v1781_v1 }
  0xbc   : > { %1306 = vmatprep.subr.bf16.mxu0 %v1764_v2  ;;  %1349 = vmatprep.subr.bf16.mxu1 %v1766_v3  ;;  %v1392_v3 = vadd.s32 1024, %v2363_v18 }
  0xbf   : > { %1307 = vmatpush1.bf16.msra.mxu0 %v1763_v8  ;;  %1350 = vmatpush1.bf16.msra.mxu1 %v1765_v10 }
  0xc0   : > { %1308 = vmatprep.subr.bf16.mxu0 %v1748_v12  ;;  %1351 = vmatprep.subr.bf16.mxu1 %v1750_v13  ;;  %v2556_v13 = vadd.s32 1152, %v2363_v18 }
  0xc3   : > { %1309 = vmatpush1.bf16.msra.mxu0 %v1747_v14  ;;  %1352 = vmatpush1.bf16.msra.mxu1 %v1749_v15 }
  0xc6   : > { %1327 = vmatmul.mubr.bf16.vlgmr.msra.gmra.mxu0 %v2239_v11  ;;  %1370 = vmatmul.mubr.bf16.vlgmr.msra.gmra.mxu1 %v2239_v11 }
  0xcc   : > { %v2361_v17 = vpop.permute.xlu0 %1426 }
  0xcd   : > { %vm1431_vm1 = vcmp.ne.s32.totalorder %v2363_v18, %v2361_v17  ;;  %vm1433_vm3 = vcmp.ne.s32.totalorder %v1386_v21, %v2361_v17  ;;  %v2378_v25 = vpop.permute.xlu1 %1497  ;;  %vm1432_vm5 = vcmp.ne.s32.totalorder %v1385_v22, %v2361_v17  ;;  %vm1434_vm8 = vcmp.ne.s32.totalorder %v1387_v24, %v2361_v17 }
  0xce   : > { %vm2385_vm6 = vmand %vm1409_vm0, %vm1431_vm1 }
  0xcf   : > { %vm2395_vm10 = vmand %vm1411_vm2, %vm1433_vm3 }
  0xd0   : > { %v2374_v11 = vpop.permute.xlu0 %1429  ;;  %vm1464_vm13 = vmand %vm1410_vm4, %vm1432_vm5 }
  0xd1   : > { %vm1447_vm9 = vcmp.ne.s32.totalorder %v2363_v18, %v2374_v11  ;;  %vm1449_vm11 = vcmp.ne.s32.totalorder %v1386_v21, %v2374_v11  ;;  %vm2406_vm15 = vmand %vm2876_vm7, %vm1434_vm8  ;;  %vm1448_vm5 = vcmp.ne.s32.totalorder %v1385_v22, %v2374_v11  ;;  %vm1450_vm8 = vcmp.ne.s32.totalorder %v1387_v24, %v2374_v11  ;;  %v2430_v37 = vpop.permute.xlu1 %1502 }
  0xd2   : > { %vm2413_vm1 = vmand %vm1409_vm0, %vm1447_vm9 }
  0xd3   : > { %vm2419_vm3 = vmand %vm1411_vm2, %vm1449_vm11 }
  0xd4   : > { %v2896_v33 = vsel %vm2419_vm3, 4294967295, %v2895_v33  ;;  %vm1480_vm2 = vmand %vm1410_vm4, %vm1448_vm5  ;;  %vm2897_vm3 = vcmp.lt.s32.totalorder %v1387_v24, %v2365_v20  ;;  %vm1437_vm5 = vcmp.ne.s32.totalorder %v1390_v36, %v2361_v17 }
 0x126   : > { %v1070_v19 = vpop.f32.mrf.mxu0  ;;  %v1113_v27 = vpop.f32.mrf.mxu1 }
 0x127   : > { %vm1505_vm12 = vcmp.gt.f32.partialorder %v1070_v19, %v2378_v25  ;;  %vm1507_vm9 = vcmp.gt.f32.partialorder %v1113_v27, %v2378_v25  ;;  %v1395_v27 = vadd.s32 1408, %v2363_v18 }
 0x128   : > { %v1072_v23 = vpop.f32.mrf.mxu0  ;;  %v1115_v32 = vpop.f32.mrf.mxu1  ;;  %vm1537_vm0 = vmand %vm2385_vm6, %vm1505_vm12  ;;  %vm2877_vm12 = vcmp.lt.s32.totalorder %v1388_v35, %v2365_v20 }
 0x129   : > { %vm1506_vm14 = vcmp.gt.f32.partialorder %v1072_v23, %v2378_v25  ;;  %vm2440_vm6 = vmand %vm2897_vm3, %vm1450_vm8  ;;  %v1569_v43 = vsel %vm1537_vm0, 1.0, %v2060_v42  ;;  %vm1436_vm0 = vcmp.ne.s32.totalorder %v2433_v39, %v2361_v17 }
 0x12a   : > { %v1074_v28 = vpop.f32.mrf.mxu0  ;;  %vm1538_vm7 = vmand %vm1464_vm13, %vm1506_vm14  ;;  %v1117_v40 = vpop.f32.mrf.mxu1  ;;  %vm1435_vm13 = vcmp.ne.s32.totalorder %v1388_v35, %v2361_v17 }
 0x12b   : > { %vm2450_vm4 = vmand %vm2395_vm10, %vm1507_vm9  ;;  %v1570_v45 = vsel %vm1538_vm7, 1.0, %v2060_v42  ;;  %vm1521_vm3 = vcmp.gt.f32.partialorder %v1074_v28, %v2430_v37  ;;  %vm1508_vm10 = vcmp.gt.f32.partialorder %v1115_v32, %v2378_v25  ;;  %v2934_v32 = vmov 0 }
 0x12c   : > { %v1076_v34 = vpop.f32.mrf.mxu0  ;;  %vm2465_vm9 = vmand %vm2877_vm12, %vm1435_vm13  ;;  %v1601_v49 = vadd.f32 %v1570_v45, %v1569_v43  ;;  %v1119_v9 = vpop.f32.mrf.mxu1  ;;  %v1571_v51 = vsel %vm2450_vm4, 1.0, %v2060_v42  ;;  %vm1438_vm12 = vcmp.ne.s32.totalorder %v1391_v47, %v2361_v17  ;;  %vm1451_vm4 = vcmp.ne.s32.totalorder %v1388_v35, %v2374_v11 }
 0x12d   : > { %vm1522_vm11 = vcmp.gt.f32.partialorder %v1076_v34, %v2430_v37  ;;  %vm1553_vm7 = vmand %vm2413_vm1, %vm1521_vm3  ;;  %vm2907_vm1 = vcmp.lt.s32.totalorder %v2433_v39, %v2365_v20 }
 0x12e   : > { %vm1554_vm8 = vmand %vm1480_vm2, %vm1522_vm11  ;;  %vm1523_vm2 = vcmp.gt.f32.partialorder %v1117_v40, %v2430_v37  ;;  %vm2904_vm11 = vcmp.lt.s32.totalorder %v1390_v36, %v2365_v20  ;;  %v1585_v56 = vsel %vm1553_vm7, 1.0, %v2060_v42  ;;  %v1603_v58 = vadd.f32 %v1601_v49, %v1571_v51 }
 0x12f   : > { %vm2474_vm14 = vmand %vm2904_vm11, %vm1437_vm5  ;;  %v1586_v52 = vsel %vm1554_vm8, 1.0, %v2060_v42  ;;  %vm1416_vm11 = vcmp.lt.s32.totalorder %v1391_v47, %v2365_v20  ;;  %vm2910_vm8 = vnez %v2896_v33  ;;  %v1398_v49 = vadd.s32 1792, %v2363_v18 }
 0x130   : > { %v2906_v50 = vsel %vm2474_vm14, 4294967295, %v2905_v50  ;;  %vm2486_vm3 = vmand %vm2907_vm1, %vm1436_vm0  ;;  %vm1524_vm0 = vcmp.gt.f32.partialorder %v1119_v9, %v2430_v37  ;;  %v1602_v59 = vadd.f32 %v1586_v52, %v1585_v56  ;;  %v1397_v56 = vadd.s32 1664, %v2363_v18 }
 0x131   : > { %v2909_v53 = vsel %vm2486_vm3, 4294967295, %v2908_v53  ;;  %vm1540_vm5 = vmand %vm2406_vm15, %vm1508_vm10  ;;  %vm1453_vm15 = vcmp.ne.s32.totalorder %v1390_v36, %v2374_v11 }
 0x132   : > { %vm2498_vm14 = vmand %vm2910_vm8, %vm1523_vm2  ;;  %v1572_v60 = vsel %vm1540_vm5, 1.0, %v2060_v42  ;;  %vm2915_vm2 = vcmp.lt.s32.totalorder %v1388_v35, %v2365_v20  ;;  %vm1452_vm5 = vcmp.ne.s32.totalorder %v2433_v39, %v2374_v11 }
 0x133   : > { %vm2510_vm7 = vmand %vm1416_vm11, %vm1438_vm12  ;;  %vm2920_vm12 = vcmp.lt.s32.totalorder %v1390_v36, %v2365_v20  ;;  %v1587_v5 = vsel %vm2498_vm14, 1.0, %v2060_v42  ;;  %v1605_v8 = vadd.f32 %v1603_v58, %v1572_v60  ;;  %vm2926_vm14 = vcmp.lt.s32.totalorder %v2433_v39, %v2365_v20 }
 0x134   : > { %vm2516_vm8 = vmand %vm2915_vm2, %vm1451_vm4  ;;  %v1604_v10 = vadd.f32 %v1602_v59, %v1587_v5  ;;  %v2693_v58 = vadd.s32 1920, %v2363_v18  ;;  %v2963_v5 = vmov 0 }
 0x146   : > { %v1156_v38 = vpop.f32.mrf.mxu0  ;;  %v1199_v54 = vpop.f32.mrf.mxu1 }
 0x147   : > { %vm1509_vm13 = vcmp.gt.f32.partialorder %v1156_v38, %v2378_v25 }
 0x148   : > { %v1158_v46 = vpop.f32.mrf.mxu0  ;;  %vm1541_vm10 = vmand %vm2465_vm9, %vm1509_vm13  ;;  %v1201_v0 = vpop.f32.mrf.mxu1 }
 0x149   : > { %vm1510_vm1 = vcmp.gt.f32.partialorder %v1158_v46, %v2378_v25  ;;  %vm2523_vm9 = vmand %vm2440_vm6, %vm1524_vm0  ;;  %v1573_v6 = vsel %vm1541_vm10, 1.0, %v2060_v42  ;;  %vm2923_vm6 = vnez %v2909_v53  ;;  %vm1454_vm0 = vcmp.ne.s32.totalorder %v1391_v47, %v2374_v11  ;;  %v1632_v53 = vld [vmem:[%s2875_s4 + $0x8] sm:$0xff] }
 0x14a   : > { %v1160_v55 = vpop.f32.mrf.mxu0  ;;  %vm2529_vm13 = vmand %vm2920_vm12, %vm1453_vm15  ;;  %vm1511_vm15 = vcmp.gt.f32.partialorder %v1199_v54, %v2378_v25  ;;  %v1607_v14 = vadd.f32 %v1605_v8, %v1573_v6  ;;  %v1203_v15 = vpop.f32.mrf.mxu1  ;;  %v1588_v19 = vsel %vm2523_vm9, 1.0, %v2060_v42  ;;  %vm2880_vm9 = vcmp.lt.s32.totalorder %v2556_v13, %v2365_v20 }
 0x14b   : > { %vm1525_vm3 = vcmp.gt.f32.partialorder %v1160_v55, %v2430_v37  ;;  %vm2545_vm4 = vmand %vm2923_vm6, %vm1510_vm1  ;;  %vm2878_vm6 = vcmp.lt.s32.totalorder %v2537_v4, %v2365_v20  ;;  %v1606_v24 = vadd.f32 %v1604_v10, %v1588_v19 }
 0x14c   : > { %v1162_v2 = vpop.f32.mrf.mxu0  ;;  %vm1557_vm2 = vmand %vm2516_vm8, %vm1525_vm3  ;;  %vm2879_vm3 = vcmp.lt.s32.totalorder %v1392_v3, %v2365_v20  ;;  %vm1439_vm8 = vcmp.ne.s32.totalorder %v1392_v3, %v2361_v17  ;;  %v1574_v22 = vsel %vm2545_vm4, 1.0, %v2060_v42  ;;  %v1205_v31 = vpop.f32.mrf.mxu1 }
 0x14d   : > { %vm1484_vm10 = vmand %vm2926_vm14, %vm1452_vm5  ;;  %vm1526_vm1 = vcmp.gt.f32.partialorder %v1162_v2, %v2430_v37  ;;  %vm2929_vm5 = vnez %v2906_v50  ;;  %v1589_v23 = vsel %vm1557_vm2, 1.0, %v2060_v42  ;;  %v1609_v29 = vadd.f32 %v1607_v14, %v1574_v22 }
 0x14e   : > { %vm2564_vm12 = vmand %vm1416_vm11, %vm1454_vm0  ;;  %vm1441_vm11 = vcmp.ne.s32.totalorder %v2537_v4, %v2361_v17  ;;  %v1608_v30 = vadd.f32 %v1606_v24, %v1589_v23  ;;  %vm1527_vm2 = vcmp.gt.f32.partialorder %v1203_v15, %v2430_v37  ;;  %v2960_v2 = vmov 0 }
 0x14f   : > { %vm2577_vm14 = vmand %vm2929_vm5, %vm1511_vm15  ;;  %vm1440_vm15 = vcmp.ne.s32.totalorder %v2556_v13, %v2361_v17  ;;  %vm1512_vm5 = vcmp.gt.f32.partialorder %v1201_v0, %v2378_v25 }
 0x150   : > { %vm1558_vm0 = vmand %vm1484_vm10, %vm1526_vm1  ;;  %v1575_v33 = vsel %vm2577_vm14, 1.0, %v2060_v42  ;;  %vm1455_vm14 = vcmp.ne.s32.totalorder %v1392_v3, %v2374_v11 }
 0x151   : > { %vm2595_vm4 = vmand %vm2879_vm3, %vm1439_vm8  ;;  %v1590_v34 = vsel %vm1558_vm0, 1.0, %v2060_v42  ;;  %vm1442_vm3 = vcmp.ne.s32.totalorder %v1395_v27, %v2361_v17  ;;  %v1611_v40 = vadd.f32 %v1609_v29, %v1575_v33 }
 0x152   : > { %vm2603_vm10 = vmand %vm2878_vm6, %vm1441_vm11  ;;  %vm1420_vm6 = vcmp.lt.s32.totalorder %v1395_v27, %v2365_v20  ;;  %v1610_v41 = vadd.f32 %v1608_v30, %v1590_v34 }
 0x153   : > { %v2935_v32 = vsel %vm2603_vm10, 4294967295, %v2934_v32  ;;  %vm2615_vm8 = vmand %vm2880_vm9, %vm1440_vm15  ;;  %vm1528_vm15 = vcmp.gt.f32.partialorder %v1205_v31, %v2430_v37  ;;  %vm1457_vm9 = vcmp.ne.s32.totalorder %v2537_v4, %v2374_v11 }
 0x154   : > { %vm1544_vm11 = vmand %vm2510_vm7, %vm1512_vm5 }
 0x155   : > { %vm2626_vm0 = vmand %vm2529_vm13, %vm1527_vm2  ;;  %v1576_v43 = vsel %vm1544_vm11, 1.0, %v2060_v42  ;;  %vm2942_vm2 = vcmp.lt.s32.totalorder %v1392_v3, %v2365_v20  ;;  %vm2949_vm11 = vcmp.lt.s32.totalorder %v2537_v4, %v2365_v20 }
 0x156   : > { %vm2639_vm13 = vmand %vm1420_vm6, %vm1442_vm3  ;;  %vm1456_vm3 = vcmp.ne.s32.totalorder %v2556_v13, %v2374_v11  ;;  %v1591_v9 = vsel %vm2626_vm0, 1.0, %v2060_v42  ;;  %v1613_v54 = vadd.f32 %v1611_v40, %v1576_v43 }
 0x157   : > { %vm2645_vm10 = vmand %vm2942_vm2, %vm1455_vm14  ;;  %v1612_v55 = vadd.f32 %v1610_v41, %v1591_v9 }
 0x158   : > { %vm2673_vm14 = vmand %vm2949_vm11, %vm1457_vm9  ;;  %vm2957_vm11 = vnez %v2935_v32 }
 0x166   : > { %v1242_v12 = vpop.f32.mrf.mxu0  ;;  %v1285_v39 = vpop.f32.mrf.mxu1 }
 0x167   : > { %vm1513_vm1 = vcmp.gt.f32.partialorder %v1242_v12, %v2378_v25  ;;  %vm1515_vm0 = vcmp.gt.f32.partialorder %v1285_v39, %v2378_v25 }
 0x168   : > { %v1244_v26 = vpop.f32.mrf.mxu0  ;;  %vm1545_vm7 = vmand %vm2595_vm4, %vm1513_vm1  ;;  %v1287_v52 = vpop.f32.mrf.mxu1 }
 0x169   : > { %vm1514_vm5 = vcmp.gt.f32.partialorder %v1244_v26, %v2378_v25  ;;  %vm2652_vm1 = vmand %vm2564_vm12, %vm1528_vm15  ;;  %v1577_v50 = vsel %vm1545_vm7, 1.0, %v2060_v42  ;;  %vm1458_vm15 = vcmp.ne.s32.totalorder %v1395_v27, %v2374_v11  ;;  %vm2952_vm7 = vcmp.lt.s32.totalorder %v2556_v13, %v2365_v20 }
 0x16a   : > { %v1246_v36 = vpop.f32.mrf.mxu0  ;;  %vm2666_vm12 = vmand %vm2615_vm8, %vm1514_vm5  ;;  %v1615_v59 = vadd.f32 %v1613_v54, %v1577_v50  ;;  %v1592_v61 = vsel %vm2652_vm1, 1.0, %v2060_v42  ;;  %v1289_v0 = vpop.f32.mrf.mxu1  ;;  %vm1459_vm1 = vcmp.ne.s32.totalorder %v1396_v48, %v2374_v11 }
 0x16b   : > { %vm1529_vm4 = vcmp.gt.f32.partialorder %v1246_v36, %v2430_v37  ;;  %vm2687_vm9 = vmand %vm2952_vm7, %vm1456_vm3  ;;  %v1578_v62 = vsel %vm2666_vm12, 1.0, %v2060_v42  ;;  %v1614_v1 = vadd.f32 %v1612_v55, %v1592_v61 }
 0x16c   : > { %v1248_v47 = vpop.f32.mrf.mxu0  ;;  %vm1561_vm8 = vmand %vm2645_vm10, %vm1529_vm4  ;;  %vm2881_vm10 = vcmp.lt.s32.totalorder %v1396_v48, %v2365_v20  ;;  %vm1443_vm4 = vcmp.ne.s32.totalorder %v1396_v48, %v2361_v17  ;;  %v1617_v3 = vadd.f32 %v1615_v59, %v1578_v62  ;;  %v1291_v8 = vpop.f32.mrf.mxu1 }
 0x16d   : > { %vm1530_vm5 = vcmp.gt.f32.partialorder %v1248_v47, %v2430_v37  ;;  %vm2697_vm2 = vmand %vm1420_vm6, %vm1458_vm15  ;;  %v1593_v63 = vsel %vm1561_vm8, 1.0, %v2060_v42  ;;  %vm1445_vm6 = vcmp.ne.s32.totalorder %v1398_v49, %v2361_v17  ;;  %vm1446_vm8 = vcmp.ne.s32.totalorder %v2693_v58, %v2361_v17  ;;  %v1631_v47 = vld [vmem:[%s2875_s4] sm:$0xff] }
 0x16e   : > { %vm2709_vm7 = vmand %vm2957_vm11, %vm1515_vm0  ;;  %vm1444_vm0 = vcmp.ne.s32.totalorder %v1397_v56, %v2361_v17  ;;  %vm1516_vm11 = vcmp.gt.f32.partialorder %v1287_v52, %v2378_v25  ;;  %v1616_v4 = vadd.f32 %v1614_v1, %v1593_v63 }
 0x16f   : > { %vm1562_vm15 = vmand %vm2687_vm9, %vm1530_vm5  ;;  %vm2962_vm9 = vcmp.lt.s32.totalorder %v1398_v49, %v2365_v20  ;;  %v1579_v6 = vsel %vm2709_vm7, 1.0, %v2060_v42  ;;  %vm1461_vm7 = vcmp.ne.s32.totalorder %v1398_v49, %v2374_v11 }
 0x170   : > { %vm2725_vm3 = vmand %vm2881_vm10, %vm1443_vm4  ;;  %vm1531_vm4 = vcmp.gt.f32.partialorder %v1289_v0, %v2430_v37  ;;  %v1594_v7 = vsel %vm1562_vm15, 1.0, %v2060_v42  ;;  %vm2965_vm10 = vcmp.lt.s32.totalorder %v1397_v56, %v2365_v20  ;;  %vm2971_vm15 = vcmp.lt.s32.totalorder %v1396_v48, %v2365_v20 }
 0x171   : > { %v2961_v2 = vsel %vm2725_vm3, 4294967295, %v2960_v2  ;;  %vm2735_vm5 = vmand %vm2962_vm9, %vm1445_vm6  ;;  %vm2968_vm9 = vcmp.lt.s32.totalorder %v2693_v58, %v2365_v20  ;;  %v1619_v13 = vadd.f32 %v1617_v3, %v1579_v6  ;;  %v1618_v14 = vadd.f32 %v1616_v4, %v1594_v7 }
 0x172   : > { %v2964_v5 = vsel %vm2735_vm5, 4294967295, %v2963_v5  ;;  %vm2747_vm12 = vmand %vm2965_vm10, %vm1444_vm0  ;;  %vm1460_vm10 = vcmp.ne.s32.totalorder %v1397_v56, %v2374_v11  ;;  %vm1532_vm0 = vcmp.gt.f32.partialorder %v1291_v8, %v2430_v37 }
 0x173   : > { %vm1548_vm6 = vmand %vm2639_vm13, %vm1516_vm11  ;;  %vm2974_vm11 = vcmp.lt.s32.totalorder %v1398_v49, %v2365_v20 }
 0x174   : > { %vm2756_vm5 = vmand %vm2968_vm9, %vm1446_vm8  ;;  %v1580_v15 = vsel %vm1548_vm6, 1.0, %v2060_v42  ;;  %vm2982_vm6 = vnez %v2961_v2 }
 0x175   : > { %vm2763_vm3 = vmand %vm2971_vm15, %vm1459_vm1  ;;  %vm2977_vm1 = vcmp.lt.s32.totalorder %v1397_v56, %v2365_v20  ;;  %v1621_v26 = vadd.f32 %v1619_v13, %v1580_v15 }
 0x176   : > { %vm1563_vm13 = vmand %vm2673_vm14, %vm1531_vm4 }
 0x177   : > { %vm2774_vm8 = vmand %vm2974_vm11, %vm1461_vm7  ;;  %v1595_v22 = vsel %vm1563_vm13, 1.0, %v2060_v42 }
 0x178   : > { %vm2780_vm9 = vmand %vm2977_vm1, %vm1460_vm10  ;;  %v1620_v27 = vadd.f32 %v1618_v14, %v1595_v22  ;;  %vm2983_vm10 = vnez %v2964_v5 }
 0x179   : > { %vm2787_vm14 = vmand %vm2697_vm2, %vm1532_vm0 }
 0x17a   : > { %v1596_v34 = vsel %vm2787_vm14, 1.0, %v2060_v42  ;;  %vm1462_vm14 = vcmp.ne.s32.totalorder %v2693_v58, %v2374_v11 }
 0x17b   : > { %v1622_v39 = vadd.f32 %v1620_v27, %v1596_v34 }
 0x186   : > { %v1328_v19 = vpop.f32.mrf.mxu0  ;;  %v1371_v24 = vpop.f32.mrf.mxu1 }
 0x187   : > { %vm1517_vm4 = vcmp.gt.f32.partialorder %v1328_v19, %v2378_v25  ;;  %vm1519_vm15 = vcmp.gt.f32.partialorder %v1371_v24, %v2378_v25 }
 0x188   : > { %vm1549_vm7 = vmand %vm2982_vm6, %vm1517_vm4  ;;  %v1330_v28 = vpop.f32.mrf.mxu0  ;;  %v1373_v31 = vpop.f32.mrf.mxu1 }
 0x189   : > { %v1581_v29 = vsel %vm1549_vm7, 1.0, %v2060_v42  ;;  %vm2798_vm13 = vmand %vm2983_vm10, %vm1519_vm15  ;;  %vm1518_vm2 = vcmp.gt.f32.partialorder %v1330_v28, %v2378_v25  ;;  %vm1520_vm11 = vcmp.gt.f32.partialorder %v1373_v31, %v2378_v25 }
 0x18a   : > { %v1623_v32 = vadd.f32 %v1621_v26, %v1581_v29  ;;  %vm1550_vm0 = vmand %vm2747_vm12, %vm1518_vm2  ;;  %v1332_v33 = vpop.f32.mrf.mxu0  ;;  %v1375_v38 = vpop.f32.mrf.mxu1  ;;  %v1583_v41 = vsel %vm2798_vm13, 1.0, %v2060_v42 }
 0x18b   : > { %v1582_v35 = vsel %vm1550_vm0, 1.0, %v2060_v42  ;;  %vm2812_vm1 = vmand %vm2756_vm5, %vm1520_vm11  ;;  %vm1533_vm4 = vcmp.gt.f32.partialorder %v1332_v33, %v2430_v37  ;;  %vm1535_vm6 = vcmp.gt.f32.partialorder %v1375_v38, %v2430_v37 }
 0x18c   : > { %v1625_v40 = vadd.f32 %v1623_v32, %v1582_v35  ;;  %vm1565_vm12 = vmand %vm2763_vm3, %vm1533_vm4  ;;  %v1334_v25 = vpop.f32.mrf.mxu0  ;;  %v1377_v44 = vpop.f32.mrf.mxu1  ;;  %v1584_v11 = vsel %vm2812_vm1, 1.0, %v2060_v42 }
 0x18d   : > { %v1597_v43 = vsel %vm1565_vm12, 1.0, %v2060_v42  ;;  %vm1567_vm5 = vmand %vm2774_vm8, %vm1535_vm6  ;;  %vm1534_vm7 = vcmp.gt.f32.partialorder %v1334_v25, %v2430_v37  ;;  %vm1536_vm15 = vcmp.gt.f32.partialorder %v1377_v44, %v2430_v37  ;;  %vm2988_vm8 = vcmp.lt.s32.totalorder %v2693_v58, %v2365_v20 }
 0x18e   : > { %v1627_v45 = vadd.f32 %v1625_v40, %v1583_v41  ;;  %v1624_v46 = vadd.f32 %v1622_v39, %v1597_v43  ;;  %vm1566_vm3 = vmand %vm2780_vm9, %vm1534_vm7  ;;  %v1599_v50 = vsel %vm1567_vm5, 1.0, %v2060_v42 }
 0x18f   : > { %v1598_v48 = vsel %vm1566_vm3, 1.0, %v2060_v42  ;;  %vm1494_vm10 = vmand %vm2988_vm8, %vm1462_vm14 }
 0x190   : > { %v1629_v49 = vadd.f32 %v1627_v45, %v1584_v11  ;;  %v1626_v9 = vadd.f32 %v1624_v46, %v1598_v48  ;;  %vm1568_vm13 = vmand %vm1494_vm10, %vm1536_vm15 }
 0x191   : > { %v1600_v52 = vsel %vm1568_vm13, 1.0, %v2060_v42 }
 0x192   : > { %v1633_v37 = vadd.f32 %v1631_v47, %v1629_v49  ;;  %v1628_v51 = vadd.f32 %v1626_v9, %v1599_v50 }
 0x194   : > { %1635 = vst [vmem:[%s2875_s4] sm:$0xff] %v1633_v37  ;;  %v1630_v54 = vadd.f32 %v1628_v51, %v1600_v52 }
 0x196   : > { %v1634_v20 = vadd.f32 %v1632_v53, %v1630_v54 }
 0x198   : > { %1636 = vst [vmem:[%s2875_s4 + $0x8] sm:$0xff] %v1634_v20 }
 0x199 PF: > { %s18_s20 = sadd.s32 1, %s2051_s20   ;;  %s2989_s15 = smov %s2035_s16 }
 0x19a   : > { %p15_p1 = scmp.ge.s32.totalorder %s18_s20, 5   ;;  %s2990_s16 = smov %s2039_s17 }
 0x19b   : > { %s2991_s17 = smov %s2162_s13  ;;  %s2992_s18 = smov %s2047_s19 }
 0x19c   : > { %s2993_s19 = smov %s2995_s28  ;;  %17 = sbr.rel (!%p15_p1) target bundleno = 5 (0x5), region = 85 }
 0x1a1   :  { %1658 = vsyncpa [#allocation3], 1 }
 0x1a2   :  { %1660 = vsyncpa [#allocation3 + $0x1], 1 }
 0x1a3   :  { %1661 = vsyncpa [#allocation5], 1 }
 0x1a4   :  { %1663 = vsyncpa [#allocation5 + $0x1], 1 }

</bundles_post_ra>
